<compile_context>
chip_gen: v7x
topology: tpu7x:2x2x1
jax: 0.10.0
libtpu: 0.0.40
codegen_flags: <defaults>
</compile_context>

<pallas_src>
import functools

import jax
import jax.numpy as jnp
from jax.experimental import pallas as pl
from jax.experimental.pallas import tpu as pltpu


def _round_up(a: int, m: int) -> int:
    return ((a + m - 1) // m) * m


def _gelu_exact(x):
    # Matches torch.nn.GELU() default (approximate='none'): 0.5 * x * (1 + erf(x / sqrt(2))).
    # Kept exact (VALU polynomial) for torch parity; tanh-approx would move work to the EUP
    # slot but changes numerics.
    return 0.5 * x * (1.0 + jax.lax.erf(x * jnp.float32(0.7071067811865475)))


def downstream_kernel(x_ref, w1_ref, b1_ref, w2_ref, b2_ref, w3t_ref, b3_ref, o_ref):
    x = x_ref[...].astype(jnp.float32)                                     # (tr, D)

    # linear1 + GELU (+ Dropout == identity in eval mode)
    h = jnp.dot(x, w1_ref[...].astype(jnp.float32),
                preferred_element_type=jnp.float32) + b1_ref[...].astype(jnp.float32)
    h = _gelu_exact(h)

    # linear2 + GELU (+ Dropout == identity in eval mode)
    h = jnp.dot(h, w2_ref[...].astype(jnp.float32),
                preferred_element_type=jnp.float32) + b2_ref[...].astype(jnp.float32)
    h = _gelu_exact(h)

    # Output head: plain (tr, D) @ (D, 8) MK.KN matmul -> (tr, 8).  No operand or result
    # transpose anywhere (avoids any hidden XLU transpose of the big activation).
    # Only column 0 is the real head output; columns 1..7 are zero-padded weights.
    y = jnp.dot(h, w3t_ref[...].astype(jnp.float32),
                preferred_element_type=jnp.float32) + b3_ref[0, 0]          # (tr, 8)
    o_ref[...] = y.astype(o_ref.dtype)


@functools.partial(jax.jit, static_argnames=("tile_rows",))
def downstream_layer(x, w1, b1, w2, b2, w3, b3, *, tile_rows=4096):
    """x: (N, D).  w1/w2: (in, out).  b1/b2: (1, out).  w3: (1, D) torch layout.  b3: (1, 1).
    Returns (N, 1)."""
    n, d = x.shape

    # Row tile: multiple of 128, large enough that small/medium N runs in a single grid step
    # (per-step overhead ~0.35us dwarfs this workload); capped at tile_rows for very large N.
    tr = min(_round_up(int(tile_rows), 128), _round_up(n, 128))
    steps = pl.cdiv(n, tr)
    n_pad = steps * tr   # every output block is full/in-bounds; padded tail rows sliced off

    # Head weight pre-transposed in the wrapper: torch (1, D) -> (D, 1), zero-padded to 8 cols.
    w3t = jnp.pad(w3.astype(x.dtype).T, ((0, 0), (0, 7)))                   # (D, 8)
    b3s = b3.astype(jnp.float32).reshape(1, 1)                              # SMEM scalar

    resident = lambda i: (0, 0)  # weights/biases: one VMEM-resident block for all grid steps

    out = pl.pallas_call(
        downstream_kernel,
        out_shape=jax.ShapeDtypeStruct((n_pad, 8), x.dtype),
        grid_spec=pltpu.PrefetchScalarGridSpec(
            num_scalar_prefetch=0,
            grid=(steps,),
            in_specs=[
                # x row tile; the last block may overhang the array (ragged N, no wrapper pad).
                # Overhang rows are garbage but map 1:1 to output rows >= n, which are sliced off.
                pl.BlockSpec((tr, d), lambda i: (i, 0)),
                pl.BlockSpec(w1.shape, resident),                           # W1 (D, D)
                pl.BlockSpec(b1.shape, resident),                           # b1 (1, D)
                pl.BlockSpec(w2.shape, resident),                           # W2 (D, D)
                pl.BlockSpec(b2.shape, resident),                           # b2 (1, D)
                pl.BlockSpec(w3t.shape, resident),                          # W3^T padded (D, 8)
                pl.BlockSpec(memory_space=pltpu.MemorySpace.SMEM),          # b3 scalar (1, 1)
            ],
            out_specs=pl.BlockSpec((tr, 8), lambda i: (i, 0)),
        ),
        compiler_params=pltpu.CompilerParams(
            dimension_semantics=("parallel",),
            vmem_limit_bytes=32 * 1024 * 1024,
        ),
    )(x, w1, b1, w2, b2, w3t, b3s)

    # Layout fixed in the wrapper: keep column 0, drop padded tail rows -> (N, 1).
    return out[:n, 0:1]


def init_params(key, latent_dim=64, dtype=jnp.float32):
    """Deterministic synthetic parameters, shapes match the PyTorch module.
    w1/w2 stored as (in, out) (torch weight transposed); w3 kept in torch layout (1, in)."""
    ks = jax.random.split(key, 6)
    scale = 1.0 / jnp.sqrt(jnp.float32(latent_dim))
    w1 = jax.random.uniform(ks[0], (latent_dim, latent_dim), dtype, -1, 1) * scale
    b1 = jax.random.uniform(ks[1], (1, latent_dim), dtype, -1, 1) * scale
    w2 = jax.random.uniform(ks[2], (latent_dim, latent_dim), dtype, -1, 1) * scale
    b2 = jax.random.uniform(ks[3], (1, latent_dim), dtype, -1, 1) * scale
    w3 = jax.random.uniform(ks[4], (1, latent_dim), dtype, -1, 1) * scale   # torch layout (1, D)
    b3 = jax.random.uniform(ks[5], (1, 1), dtype, -1, 1) * scale
    return w1, b1, w2, b2, w3, b3


def reference(x, w1, b1, w2, b2, w3, b3):
    h = jax.nn.gelu(x @ w1 + b1, approximate=False)
    h = jax.nn.gelu(h @ w2 + b2, approximate=False)
    return h @ w3.T + b3


if __name__ == "__main__":
    latent_dim = 64      # "hidden_dim*2" in the module docstring
    num_graphs = 300     # not a multiple of 8/128 -> exercises the ragged tail without any pad op

    key = jax.random.PRNGKey(0)
    kx, kp = jax.random.split(key)
    x = jax.random.normal(kx, (num_graphs, latent_dim), jnp.float32)
    params = init_params(kp, latent_dim)

    # Default tile_rows -> tr = 384, grid = (1,): whole problem in one grid step.
    out = downstream_layer(x, *params)
    out = jax.block_until_ready(out)

    ref = reference(x, *params)
    assert out.shape == (num_graphs, 1)
    assert jnp.allclose(out, ref, atol=1e-4, rtol=1e-4), "mismatch vs reference"

    # TODO(synk): nn.Dropout(p=0.3) is implemented as eval-mode identity (no in-kernel RNG masking).
    print("KERNEL_OK")
</pallas_src>

<mosaic_0001>
module attributes {stable_mosaic.version = 11 : i64} {
  func.func @downstream_kernel(%arg0: i32, %arg1: memref<384x64xf32, #tpu.memory_space<vmem>>, %arg2: memref<64x64xf32, #tpu.memory_space<vmem>>, %arg3: memref<1x64xf32, #tpu.memory_space<vmem>>, %arg4: memref<64x64xf32, #tpu.memory_space<vmem>>, %arg5: memref<1x64xf32, #tpu.memory_space<vmem>>, %arg6: memref<64x8xf32, #tpu.memory_space<vmem>>, %arg7: memref<1x1xf32, #tpu.memory_space<smem>>, %arg8: memref<384x8xf32, #tpu.memory_space<vmem>>) attributes {dimension_semantics = [#tpu.dimension_semantics<parallel>], iteration_bounds = array<i64: 1>, scalar_prefetch = 0 : i64, scratch_operands = 0 : i64, tpu.core_type = #tpu.core_type<tc>, window_params = [{transform_indices = @transform_0, window_bounds = array<i64: 384, 64>}, {pipeline_mode = #tpu.pipeline_mode<synchronous>, transform_indices = @transform_1, window_bounds = array<i64: 64, 64>}, {pipeline_mode = #tpu.pipeline_mode<synchronous>, transform_indices = @transform_2, window_bounds = array<i64: 1, 64>}, {pipeline_mode = #tpu.pipeline_mode<synchronous>, transform_indices = @transform_3, window_bounds = array<i64: 64, 64>}, {pipeline_mode = #tpu.pipeline_mode<synchronous>, transform_indices = @transform_4, window_bounds = array<i64: 1, 64>}, {pipeline_mode = #tpu.pipeline_mode<synchronous>, transform_indices = @transform_5, window_bounds = array<i64: 64, 8>}, {transform_indices = @transform_6, window_bounds = array<i64: 1, 1>}, {transform_indices = @transform_7, window_bounds = array<i64: 384, 8>}]} {
    %c0 = arith.constant 0 : index
    %c0_0 = arith.constant 0 : index
    %0 = vector.load %arg1[%c0, %c0_0] : memref<384x64xf32, #tpu.memory_space<vmem>>, vector<384x64xf32>
    %c0_1 = arith.constant 0 : index
    %c0_2 = arith.constant 0 : index
    %1 = vector.load %arg2[%c0_1, %c0_2] : memref<64x64xf32, #tpu.memory_space<vmem>>, vector<64x64xf32>
    %cst = arith.constant dense<0.000000e+00> : vector<384x64xf32>
    %2 = tpu.matmul %0, %1, %cst {dimension_numbers = #tpu.dot_dimension_numbers<[1], [0], [0], [1], [0, 0, 1, 1], [], []>} : vector<384x64xf32>, vector<64x64xf32>, vector<384x64xf32> -> vector<384x64xf32>
    %c0_3 = arith.constant 0 : index
    %c0_4 = arith.constant 0 : index
    %3 = vector.load %arg3[%c0_3, %c0_4] : memref<1x64xf32, #tpu.memory_space<vmem>>, vector<1x64xf32>
    %4 = vector.broadcast %3 : vector<1x64xf32> to vector<384x64xf32>
    %5 = arith.addf %2, %4 : vector<384x64xf32>
    %cst_5 = arith.constant 5.000000e-01 : f32
    %6 = vector.broadcast %cst_5 : f32 to vector<384x64xf32>
    %7 = arith.mulf %6, %5 : vector<384x64xf32>
    %cst_6 = arith.constant 0.707106769 : f32
    %8 = vector.broadcast %cst_6 : f32 to vector<384x64xf32>
    %9 = arith.mulf %5, %8 : vector<384x64xf32>
    %10 = math.erf %9 : vector<384x64xf32>
    %cst_7 = arith.constant 1.000000e+00 : f32
    %11 = vector.broadcast %cst_7 : f32 to vector<384x64xf32>
    %12 = arith.addf %11, %10 : vector<384x64xf32>
    %13 = arith.mulf %7, %12 : vector<384x64xf32>
    %c0_8 = arith.constant 0 : index
    %c0_9 = arith.constant 0 : index
    %14 = vector.load %arg4[%c0_8, %c0_9] : memref<64x64xf32, #tpu.memory_space<vmem>>, vector<64x64xf32>
    %cst_10 = arith.constant dense<0.000000e+00> : vector<384x64xf32>
    %15 = tpu.matmul %13, %14, %cst_10 {dimension_numbers = #tpu.dot_dimension_numbers<[1], [0], [0], [1], [0, 0, 1, 1], [], []>} : vector<384x64xf32>, vector<64x64xf32>, vector<384x64xf32> -> vector<384x64xf32>
    %c0_11 = arith.constant 0 : index
    %c0_12 = arith.constant 0 : index
    %16 = vector.load %arg5[%c0_11, %c0_12] : memref<1x64xf32, #tpu.memory_space<vmem>>, vector<1x64xf32>
    %17 = vector.broadcast %16 : vector<1x64xf32> to vector<384x64xf32>
    %18 = arith.addf %15, %17 : vector<384x64xf32>
    %cst_13 = arith.constant 5.000000e-01 : f32
    %19 = vector.broadcast %cst_13 : f32 to vector<384x64xf32>
    %20 = arith.mulf %19, %18 : vector<384x64xf32>
    %cst_14 = arith.constant 0.707106769 : f32
    %21 = vector.broadcast %cst_14 : f32 to vector<384x64xf32>
    %22 = arith.mulf %18, %21 : vector<384x64xf32>
    %23 = math.erf %22 : vector<384x64xf32>
    %cst_15 = arith.constant 1.000000e+00 : f32
    %24 = vector.broadcast %cst_15 : f32 to vector<384x64xf32>
    %25 = arith.addf %24, %23 : vector<384x64xf32>
    %26 = arith.mulf %20, %25 : vector<384x64xf32>
    %c0_16 = arith.constant 0 : index
    %c0_17 = arith.constant 0 : index
    %27 = vector.load %arg6[%c0_16, %c0_17] : memref<64x8xf32, #tpu.memory_space<vmem>>, vector<64x8xf32>
    %cst_18 = arith.constant dense<0.000000e+00> : vector<384x8xf32>
    %28 = tpu.matmul %26, %27, %cst_18 {dimension_numbers = #tpu.dot_dimension_numbers<[1], [0], [0], [1], [0, 0, 1, 1], [], []>} : vector<384x64xf32>, vector<64x8xf32>, vector<384x8xf32> -> vector<384x8xf32>
    %c0_19 = arith.constant 0 : index
    %c0_20 = arith.constant 0 : index
    %29 = memref.load %arg7[%c0_19, %c0_20] : memref<1x1xf32, #tpu.memory_space<smem>>
    %30 = vector.broadcast %29 : f32 to vector<384x8xf32>
    %31 = arith.addf %28, %30 : vector<384x8xf32>
    %c0_21 = arith.constant 0 : index
    %c0_22 = arith.constant 0 : index
    %32 = vector.load %arg8[%c0_21, %c0_22] : memref<384x8xf32, #tpu.memory_space<vmem>>, vector<384x8xf32>
    tpu.vector_store %arg8[%c0_21, %c0_22], %31 {strides = array<i32>} : memref<384x8xf32, #tpu.memory_space<vmem>>, vector<384x8xf32>,
    return
  }
  func.func @transform_0(%arg0: i32) -> (i32, i32) {
    %c0_i32 = arith.constant 0 : i32
    %c0_i32_0 = arith.constant 0 : i32
    return %arg0, %c0_i32 : i32, i32
  }
  func.func @transform_1(%arg0: i32) -> (i32, i32) {
    %c0_i32 = arith.constant 0 : i32
    %c0_i32_0 = arith.constant 0 : i32
    %c0_i32_1 = arith.constant 0 : i32
    return %c0_i32, %c0_i32_0 : i32, i32
  }
  func.func @transform_2(%arg0: i32) -> (i32, i32) {
    %c0_i32 = arith.constant 0 : i32
    %c0_i32_0 = arith.constant 0 : i32
    %c0_i32_1 = arith.constant 0 : i32
    return %c0_i32, %c0_i32_0 : i32, i32
  }
  func.func @transform_3(%arg0: i32) -> (i32, i32) {
    %c0_i32 = arith.constant 0 : i32
    %c0_i32_0 = arith.constant 0 : i32
    %c0_i32_1 = arith.constant 0 : i32
    return %c0_i32, %c0_i32_0 : i32, i32
  }
  func.func @transform_4(%arg0: i32) -> (i32, i32) {
    %c0_i32 = arith.constant 0 : i32
    %c0_i32_0 = arith.constant 0 : i32
    %c0_i32_1 = arith.constant 0 : i32
    return %c0_i32, %c0_i32_0 : i32, i32
  }
  func.func @transform_5(%arg0: i32) -> (i32, i32) {
    %c0_i32 = arith.constant 0 : i32
    %c0_i32_0 = arith.constant 0 : i32
    %c0_i32_1 = arith.constant 0 : i32
    return %c0_i32, %c0_i32_0 : i32, i32
  }
  func.func @transform_6(%arg0: i32) -> (i32, i32) {
    %c0_i32 = arith.constant 0 : i32
    %c0_i32_0 = arith.constant 0 : i32
    %c0_i32_1 = arith.constant 0 : i32
    return %c0_i32, %c0_i32_0 : i32, i32
  }
  func.func @transform_7(%arg0: i32) -> (i32, i32) {
    %c0_i32 = arith.constant 0 : i32
    %c0_i32_0 = arith.constant 0 : i32
    return %arg0, %c0_i32 : i32, i32
  }
}

</mosaic_0001>

<bundles_post_ra>
// kernel: downstream_layer.1
= control target key start
LH: loop header
LB: loop body
LE: loop exit
PB: predicated region body
PF: predicated region fallthrough
CT: control target
= control target key end

     0   :  { %vm90_vm0 = vcmask 523264   ;;  %vm1943_vm1 = vcmask 64512   ;;  %s3945_s1 = inlined_call_operand.vmem [shape: f32[64,64], index: 1, kind: input, shape index: {}]   ;;  %s3946_s0 = inlined_call_operand.vmem [shape: f32[300,64], index: 0, kind: input, shape index: {}]   ;;  %s3947_s3 = inlined_call_operand.vmem [shape: f32[64,64], index: 3, kind: input, shape index: {}]   ;;  %s3948_s5 = inlined_call_operand.vmem [shape: f32[64,8], index: 5, kind: input, shape index: {}]   ;;  %s3949_s2 = inlined_call_operand.vmem [shape: f32[1,64], index: 2, kind: input, shape index: {}]   ;;  %s3950_s4 = inlined_call_operand.vmem [shape: f32[1,64], index: 4, kind: input, shape index: {}]   ;;  %s3951_s6 = inlined_call_operand.<no memory space> [shape: f32[1,1], index: 6, kind: input, shape index: {}]   ;;  %s3952_s7 = inlined_call_operand.vmem [shape: f32[384,8], index: 7, kind: output, shape index: {}]  }
   0x1   :  { %v75_v0 = vld [vmem:[%s3945_s1] sm:$0xff]  ;;  %v76_v1 = vld [vmem:[%s3945_s1 + $0x8] sm:$0xff]  ;;  %v77_v2 = vld [vmem:[%s3945_s1 + $0x10] sm:$0xff] }
   0x2   :  { %v2574_v3 = vpack.c.bf16 %v76_v1, %v75_v0  ;;  %v78_v4 = vld [vmem:[%s3945_s1 + $0x18] sm:$0xff]  ;;  %v79_v6 = vld [vmem:[%s3945_s1 + $0x20] sm:$0xff]  ;;  %v80_v7 = vld [vmem:[%s3945_s1 + $0x28] sm:$0xff] }
   0x3   :  { %v2578_v5 = vpack.c.bf16 %v78_v4, %v77_v2  ;;  %v27_v8 = vld [vmem:[%s3946_s0] sm:$0xff]  ;;  %v2582_v9 = vpack.c.bf16 %v80_v7, %v79_v6  ;;  %v81_v10 = vld [vmem:[%s3945_s1 + $0x30] sm:$0xff]  ;;  %v82_v11 = vld [vmem:[%s3945_s1 + $0x38] sm:$0xff] }
   0x4   :  { %2575 = vmatprep.subr.bf16.mxu0 %v2574_v3  ;;  %2326 = vmatprep.mubr.msk.f32.mxu0 %vm90_vm0, %v27_v8  ;;  %v51_v12 = vld [vmem:[%s3946_s0 + $0xc0] sm:$0xff]  ;;  %v2586_v13 = vpack.c.bf16 %v82_v11, %v81_v10  ;;  %v28_v14 = vld [vmem:[%s3946_s0 + $0x8] sm:$0xff]  ;;  %v29_v15 = vld [vmem:[%s3946_s0 + $0x10] sm:$0xff] }
   0x5   :  { %2577 = vmatpush3.bf16.msra.mxu0 %v2574_v3  ;;  %2622 = vmatprep.subr.bf16.mxu1 %v2574_v3  ;;  %v52_v16 = vld [vmem:[%s3946_s0 + $0xc8] sm:$0xff]  ;;  %v53_v17 = vld [vmem:[%s3946_s0 + $0xd0] sm:$0xff]  ;;  %v780_v18 = vld [vmem:[%s3947_s3] sm:$0xff] }
   0x6   :  { %2579 = vmatprep.subr.bf16.mxu0 %v2578_v5  ;;  %2626 = vmatpush3.bf16.msra.mxu1 %v2574_v3  ;;  %v781_v19 = vld [vmem:[%s3947_s3 + $0x8] sm:$0xff]  ;;  %v782_v20 = vld [vmem:[%s3947_s3 + $0x10] sm:$0xff]  ;;  %v783_v21 = vld [vmem:[%s3947_s3 + $0x18] sm:$0xff] }
   0x7   :  { %2623 = vmatprep.subr.bf16.mxu1 %v2578_v5  ;;  %2362 = vmatprep.mubr.msk.f32.mxu1 %vm90_vm0, %v51_v12  ;;  %v30_v22 = vld [vmem:[%s3946_s0 + $0x18] sm:$0xff]  ;;  %v2590_v23 = vpack.c.bf16 %v781_v19, %v780_v18  ;;  %v31_v24 = vld [vmem:[%s3946_s0 + $0x20] sm:$0xff]  ;;  %v2594_v26 = vpack.c.bf16 %v783_v21, %v782_v20  ;;  %v785_v29 = vld [vmem:[%s3947_s3 + $0x28] sm:$0xff] }
   0x8   :  { %v54_v25 = vld [vmem:[%s3946_s0 + $0xd8] sm:$0xff]  ;;  %v55_v27 = vld [vmem:[%s3946_s0 + $0xe0] sm:$0xff]  ;;  %v32_v30 = vld [vmem:[%s3946_s0 + $0x28] sm:$0xff] }
   0x9   :  { %2581 = vmatpush3.bf16.msra.mxu0 %v2578_v5  ;;  %v784_v28 = vld [vmem:[%s3947_s3 + $0x20] sm:$0xff]  ;;  %v33_v31 = vld [vmem:[%s3946_s0 + $0x30] sm:$0xff]  ;;  %v56_v32 = vld [vmem:[%s3946_s0 + $0xe8] sm:$0xff] }
   0xa   :  { %2583 = vmatprep.subr.bf16.mxu0 %v2582_v9  ;;  %2627 = vmatpush3.bf16.msra.mxu1 %v2578_v5  ;;  %v2598_v33 = vpack.c.bf16 %v785_v29, %v784_v28  ;;  %v57_v34 = vld [vmem:[%s3946_s0 + $0xf0] sm:$0xff]  ;;  %v34_v35 = vld [vmem:[%s3946_s0 + $0x38] sm:$0xff]  ;;  %v35_v36 = vld [vmem:[%s3946_s0 + $0x40] sm:$0xff] }
   0xb   :  { %2624 = vmatprep.subr.bf16.mxu1 %v2582_v9  ;;  %v58_v37 = vld [vmem:[%s3946_s0 + $0xf8] sm:$0xff]  ;;  %v59_v38 = vld [vmem:[%s3946_s0 + $0x100] sm:$0xff]  ;;  %v36_v39 = vld [vmem:[%s3946_s0 + $0x48] sm:$0xff] }
   0xc   :  { %v37_v40 = vld [vmem:[%s3946_s0 + $0x50] sm:$0xff]  ;;  %v60_v41 = vld [vmem:[%s3946_s0 + $0x108] sm:$0xff]  ;;  %v38_v43 = vld [vmem:[%s3946_s0 + $0x58] sm:$0xff] }
   0xd   :  { %2585 = vmatpush3.bf16.msra.mxu0 %v2582_v9  ;;  %v61_v42 = vld [vmem:[%s3946_s0 + $0x110] sm:$0xff]  ;;  %v39_v44 = vld [vmem:[%s3946_s0 + $0x60] sm:$0xff]  ;;  %v62_v45 = vld [vmem:[%s3946_s0 + $0x118] sm:$0xff] }
   0xe   :  { %2587 = vmatprep.subr.bf16.mxu0 %v2586_v13  ;;  %2628 = vmatpush3.bf16.msra.mxu1 %v2582_v9  ;;  %v63_v46 = vld [vmem:[%s3946_s0 + $0x120] sm:$0xff]  ;;  %v40_v47 = vld [vmem:[%s3946_s0 + $0x68] sm:$0xff]  ;;  %v41_v48 = vld [vmem:[%s3946_s0 + $0x70] sm:$0xff] }
   0xf   :  { %2625 = vmatprep.subr.bf16.mxu1 %v2586_v13  ;;  %v64_v49 = vld [vmem:[%s3946_s0 + $0x128] sm:$0xff]  ;;  %v65_v50 = vld [vmem:[%s3946_s0 + $0x130] sm:$0xff]  ;;  %v42_v51 = vld [vmem:[%s3946_s0 + $0x78] sm:$0xff] }
  0x10   :  { %v43_v52 = vld [vmem:[%s3946_s0 + $0x80] sm:$0xff]  ;;  %v66_v53 = vld [vmem:[%s3946_s0 + $0x138] sm:$0xff]  ;;  %v44_v55 = vld [vmem:[%s3946_s0 + $0x88] sm:$0xff] }
  0x11   :  { %2589 = vmatpush3.bf16.msra.mxu0 %v2586_v13  ;;  %v67_v54 = vld [vmem:[%s3946_s0 + $0x140] sm:$0xff]  ;;  %v45_v56 = vld [vmem:[%s3946_s0 + $0x90] sm:$0xff]  ;;  %v68_v57 = vld [vmem:[%s3946_s0 + $0x148] sm:$0xff] }
  0x12   :  { %2629 = vmatpush3.bf16.msra.mxu1 %v2586_v13  ;;  %v69_v58 = vld [vmem:[%s3946_s0 + $0x150] sm:$0xff]  ;;  %v46_v59 = vld [vmem:[%s3946_s0 + $0x98] sm:$0xff]  ;;  %v47_v60 = vld [vmem:[%s3946_s0 + $0xa0] sm:$0xff] }
  0x13   :  { %2591 = vmatprep.subr.bf16.mxu1 %v2590_v23  ;;  %v70_v61 = vld [vmem:[%s3946_s0 + $0x158] sm:$0xff]  ;;  %v71_v62 = vld [vmem:[%s3946_s0 + $0x160] sm:$0xff]  ;;  %v48_v63 = vld [vmem:[%s3946_s0 + $0xa8] sm:$0xff] }
  0x14   :  { %2327 = vmatmul.mubr.msk.f32.vlgmr.msra.gmra.mrb[0].mxu0 %vm90_vm0, %v28_v14  ;;  %v49_v0 = vld [vmem:[%s3946_s0 + $0xb0] sm:$0xff]  ;;  %v72_v1 = vld [vmem:[%s3946_s0 + $0x168] sm:$0xff]  ;;  %v50_v3 = vld [vmem:[%s3946_s0 + $0xb8] sm:$0xff] }
  0x15   :  { %2329 = vmatprep.mubr.msk.f32.mxu0 %vm90_vm0, %v29_v15  ;;  %2363 = vmatmul.mubr.msk.f32.vlgmr.msra.gmra.mrb[0].mxu1 %vm90_vm0, %v52_v16  ;;  %v73_v2 = vld [vmem:[%s3946_s0 + $0x170] sm:$0xff]  ;;  %v74_v4 = vld [vmem:[%s3946_s0 + $0x178] sm:$0xff]  ;;  %v1484_v8 = vld [vmem:[%s3948_s5] sm:$0xff] }
  0x16   :  { %2365 = vmatprep.mubr.msk.f32.mxu1 %vm90_vm0, %v53_v17  ;;  %2593 = vmatpush3.bf16.msra.mxu1 %v2590_v23  ;;  %v786_v5 = vld [vmem:[%s3947_s3 + $0x30] sm:$0xff]  ;;  %v787_v6 = vld [vmem:[%s3947_s3 + $0x38] sm:$0xff]  ;;  %v1485_v9 = vld [vmem:[%s3948_s5 + $0x8] sm:$0xff] }
  0x17   :  { %2595 = vmatprep.subr.bf16.mxu1 %v2594_v26  ;;  %v2602_v7 = vpack.c.bf16 %v787_v6, %v786_v5  ;;  %v1486_v10 = vld [vmem:[%s3948_s5 + $0x10] sm:$0xff]  ;;  %v2606_v11 = vpack.c.bf16 %v1485_v9, %v1484_v8  ;;  %v1487_v12 = vld [vmem:[%s3948_s5 + $0x18] sm:$0xff]  ;;  %v1488_v14 = vld [vmem:[%s3948_s5 + $0x20] sm:$0xff] }
  0x18   :  { %2330 = vmatmul.mubr.msk.f32.gmra.mrb[2].mxu0 %vm90_vm0, %v30_v22  ;;  %v2610_v13 = vpack.c.bf16 %v1487_v12, %v1486_v10  ;;  %v1489_v15 = vld [vmem:[%s3948_s5 + $0x28] sm:$0xff]  ;;  %v3123_v17 = vld [vmem:[%s3949_s2] ss:$0 sm:$0xff] }
  0x19   :  { %2332 = vmatprep.mubr.msk.f32.mxu0 %vm90_vm0, %v31_v24  ;;  %2366 = vmatmul.mubr.msk.f32.gmra.mrb[2].mxu1 %vm90_vm0, %v54_v25  ;;  %v2614_v16 = vpack.c.bf16 %v1489_v15, %v1488_v14 }
  0x1a   :  { %2368 = vmatprep.mubr.msk.f32.mxu1 %vm90_vm0, %v55_v27  ;;  %2597 = vmatpush3.bf16.msra.mxu1 %v2594_v26 }
  0x1b   :  { %2599 = vmatprep.subr.bf16.mxu1 %v2598_v33  ;;  %2607 = vmatprep.subr.bf16.mxu0 %v2606_v11 }
  0x1c   :  { %2333 = vmatmul.mubr.msk.f32.gmra.mrb[4].mxu0 %vm90_vm0, %v32_v30 }
  0x1d   :  { %2335 = vmatprep.mubr.msk.f32.mxu0 %vm90_vm0, %v33_v31  ;;  %2369 = vmatmul.mubr.msk.f32.gmra.mrb[4].mxu1 %vm90_vm0, %v56_v32 }
  0x1e   :  { %2371 = vmatprep.mubr.msk.f32.mxu1 %vm90_vm0, %v57_v34  ;;  %2601 = vmatpush3.bf16.msra.mxu1 %v2598_v33 }
  0x1f   :  { %2603 = vmatprep.subr.bf16.mxu1 %v2602_v7  ;;  %2609 = vmatpush3.bf16.msra.mxu0 %v2606_v11 }
  0x20   :  { %2336 = vmatmul.mubr.msk.f32.gmra.mrb[6].mxu0 %vm90_vm0, %v34_v35  ;;  %2611 = vmatprep.subr.bf16.mxu0 %v2610_v13 }
  0x21   :  { %2338 = vmatprep.mubr.msk.f32.mxu0 %vm90_vm0, %v35_v36  ;;  %2372 = vmatmul.mubr.msk.f32.gmra.mrb[6].mxu1 %vm90_vm0, %v58_v37 }
  0x22   :  { %2374 = vmatprep.mubr.msk.f32.mxu1 %vm90_vm0, %v59_v38  ;;  %2605 = vmatpush3.bf16.msra.mxu1 %v2602_v7 }
  0x23   :  { %2613 = vmatpush3.bf16.msra.mxu0 %v2610_v13 }
  0x24   :  { %2339 = vmatmul.mubr.msk.f32.gmra.mrb[8].mxu0 %vm90_vm0, %v36_v39  ;;  %2615 = vmatprep.subr.bf16.mxu0 %v2614_v16 }
  0x25   :  { %2341 = vmatprep.mubr.msk.f32.mxu0 %vm90_vm0, %v37_v40  ;;  %2375 = vmatmul.mubr.msk.f32.gmra.mrb[8].mxu1 %vm90_vm0, %v60_v41 }
  0x26   :  { %2377 = vmatprep.mubr.msk.f32.mxu1 %vm90_vm0, %v61_v42 }
  0x27   :  { %2617 = vmatpush3.bf16.msra.mxu0 %v2614_v16 }
  0x28   :  { %2342 = vmatmul.mubr.msk.f32.gmra.mrb[10].mxu0 %vm90_vm0, %v38_v43 }
  0x29   :  { %2344 = vmatprep.mubr.msk.f32.mxu0 %vm90_vm0, %v39_v44  ;;  %2378 = vmatmul.mubr.msk.f32.gmra.mrb[10].mxu1 %vm90_vm0, %v62_v45 }
  0x2a   :  { %2380 = vmatprep.mubr.msk.f32.mxu1 %vm90_vm0, %v63_v46 }
  0x2c   :  { %2345 = vmatmul.mubr.msk.f32.gmra.mrb[12].mxu0 %vm90_vm0, %v40_v47 }
  0x2d   :  { %2347 = vmatprep.mubr.msk.f32.mxu0 %vm90_vm0, %v41_v48  ;;  %2381 = vmatmul.mubr.msk.f32.gmra.mrb[12].mxu1 %vm90_vm0, %v64_v49 }
  0x2e   :  { %2383 = vmatprep.mubr.msk.f32.mxu1 %vm90_vm0, %v65_v50 }
  0x30   :  { %2348 = vmatmul.mubr.msk.f32.gmra.mrb[14].mxu0 %vm90_vm0, %v42_v51 }
  0x31   :  { %2350 = vmatprep.mubr.msk.f32.mxu0 %vm90_vm0, %v43_v52  ;;  %2384 = vmatmul.mubr.msk.f32.gmra.mrb[14].mxu1 %vm90_vm0, %v66_v53 }
  0x32   :  { %2386 = vmatprep.mubr.msk.f32.mxu1 %vm90_vm0, %v67_v54 }
  0x34   :  { %2351 = vmatmul.mubr.msk.f32.gmra.mrb[16].mxu0 %vm90_vm0, %v44_v55 }
  0x35   :  { %2353 = vmatprep.mubr.msk.f32.mxu0 %vm90_vm0, %v45_v56  ;;  %2387 = vmatmul.mubr.msk.f32.gmra.mrb[16].mxu1 %vm90_vm0, %v68_v57 }
  0x36   :  { %2389 = vmatprep.mubr.msk.f32.mxu1 %vm90_vm0, %v69_v58 }
  0x38   :  { %2354 = vmatmul.mubr.msk.f32.gmra.mrb[18].mxu0 %vm90_vm0, %v46_v59 }
  0x39   :  { %2356 = vmatprep.mubr.msk.f32.mxu0 %vm90_vm0, %v47_v60  ;;  %2390 = vmatmul.mubr.msk.f32.gmra.mrb[18].mxu1 %vm90_vm0, %v70_v61 }
  0x3a   :  { %2392 = vmatprep.mubr.msk.f32.mxu1 %vm90_vm0, %v71_v62 }
  0x3c   :  { %2357 = vmatmul.mubr.msk.f32.gmra.mrb[20].mxu0 %vm90_vm0, %v48_v63 }
  0x3d   :  { %2359 = vmatprep.mubr.msk.f32.mxu0 %vm90_vm0, %v49_v0  ;;  %2393 = vmatmul.mubr.msk.f32.gmra.mrb[20].mxu1 %vm90_vm0, %v72_v1 }
  0x3e   :  { %2395 = vmatprep.mubr.msk.f32.mxu1 %vm90_vm0, %v73_v2 }
  0x40   :  { %2360 = vmatmul.mubr.msk.f32.gmra.mrb[22].mxu0 %vm90_vm0, %v50_v3 }
  0x41   :  { %2396 = vmatmul.mubr.msk.f32.gmra.mrb[22].mxu1 %vm90_vm0, %v74_v4 }
  0xe7   :  { %v2328_v18 = vpop.f32.mrb[0].mxu0 }
  0xe8   :  { %v307_v19 = vadd.f32 %v2328_v18, %v3123_v17  ;;  %v301_v20 = vpop.f32.mrb[1].mxu0  ;;  %v3126_v21 = vpop.f32.mrb[0].mxu1 }
  0xe9   :  { %v302_v22 = vadd.f32 %v3123_v17, %v301_v20  ;;  %v3129_v23 = vpop.f32.mrb[1].mxu1 }
  0xea   :  { %v589_v24 = vmul.f32 0.70710677, %v307_v19  ;;  %v541_v59 = vmul.f32 0.5, %v307_v19 }
  0xeb   :  { %v588_v25 = vmul.f32 0.70710677, %v302_v22  ;;  %v2331_v26 = vpop.f32.mrb[2].mxu0  ;;  %v540_v54 = vmul.f32 0.5, %v302_v22 }
  0xec   :  { %2630 = verf.f32 %v589_v24  ;;  %v317_v27 = vadd.f32 %v2331_v26, %v3123_v17  ;;  %v311_v28 = vpop.f32.mrb[3].mxu0  ;;  %v3132_v29 = vpop.f32.mrb[2].mxu1 }
  0xed   :  { %2632 = verf.f32 %v588_v25  ;;  %v312_v30 = vadd.f32 %v3123_v17, %v311_v28  ;;  %v3135_v31 = vpop.f32.mrb[3].mxu1 }
  0xee   :  { %v591_v32 = vmul.f32 0.70710677, %v317_v27  ;;  %v543_v11 = vmul.f32 0.5, %v317_v27 }
  0xef   :  { %v590_v33 = vmul.f32 0.70710677, %v312_v30  ;;  %v2334_v34 = vpop.f32.mrb[4].mxu0  ;;  %v542_v6 = vmul.f32 0.5, %v312_v30 }
  0xf0   :  { %2634 = verf.f32 %v591_v32  ;;  %v3138_v35 = vadd.f32 %v2334_v34, %v3123_v17  ;;  %v321_v36 = vpop.f32.mrb[5].mxu0  ;;  %v3140_v37 = vpop.f32.mrb[4].mxu1 }
  0xf1   :  { %2636 = verf.f32 %v590_v33  ;;  %v322_v38 = vadd.f32 %v3123_v17, %v321_v36  ;;  %v3143_v39 = vpop.f32.mrb[5].mxu1 }
  0xf2   :  { %v593_v40 = vmul.f32 0.70710677, %v3138_v35  ;;  %v545_v32 = vmul.f32 0.5, %v3138_v35 }
  0xf3   :  { %v592_v41 = vmul.f32 0.70710677, %v322_v38  ;;  %v2337_v42 = vpop.f32.mrb[6].mxu0  ;;  %v544_v25 = vmul.f32 0.5, %v322_v38 }
  0xf4   :  { %2638 = verf.f32 %v593_v40  ;;  %v3147_v43 = vadd.f32 %v2337_v42, %v3123_v17  ;;  %v331_v44 = vpop.f32.mrb[7].mxu0  ;;  %v3149_v45 = vpop.f32.mrb[6].mxu1 }
  0xf5   :  { %2640 = verf.f32 %v592_v41  ;;  %v3152_v46 = vadd.f32 %v3123_v17, %v331_v44  ;;  %v3154_v47 = vpop.f32.mrb[7].mxu1 }
  0xf6   :  { %v2631_v48 = vpop.eup %2630  ;;  %v595_v49 = vmul.f32 0.70710677, %v3147_v43 }
  0xf7   :  { %v2633_v50 = vpop.eup %2632  ;;  %v685_v51 = vadd.f32 1.0, %v2631_v48  ;;  %v594_v52 = vmul.f32 0.70710677, %v3152_v46  ;;  %v2340_v53 = vpop.f32.mrb[8].mxu0  ;;  %v546_v35 = vmul.f32 0.5, %v3152_v46 }
  0xf8   :  { %v684_v55 = vadd.f32 1.0, %v2633_v50  ;;  %2642 = verf.f32 %v595_v49  ;;  %v3159_v56 = vadd.f32 %v2340_v53, %v3123_v17  ;;  %v341_v57 = vpop.f32.mrb[9].mxu0  ;;  %v3161_v58 = vpop.f32.mrb[8].mxu1 }
  0xf9   :  { %2644 = verf.f32 %v594_v52  ;;  %v3164_v60 = vadd.f32 %v3123_v17, %v341_v57  ;;  %v3166_v61 = vpop.f32.mrb[9].mxu1  ;;  %v733_v2 = vmul.f32 %v685_v51, %v541_v59 }
  0xfa   :  { %v2635_v62 = vpop.eup %2634  ;;  %v732_v63 = vmul.f32 %v684_v55, %v540_v54  ;;  %v597_v0 = vmul.f32 0.70710677, %v3159_v56  ;;  %v547_v54 = vmul.f32 0.5, %v3147_v43 }
  0xfb   :  { %v2637_v1 = vpop.eup %2636  ;;  %v687_v3 = vadd.f32 1.0, %v2635_v62  ;;  %v596_v4 = vmul.f32 0.70710677, %v3164_v60  ;;  %v2343_v5 = vpop.f32.mrb[10].mxu0  ;;  %v548_v43 = vmul.f32 0.5, %v3164_v60 }
  0xfc   :  { %v686_v7 = vadd.f32 1.0, %v2637_v1  ;;  %2646 = verf.f32 %v597_v0  ;;  %v3171_v8 = vadd.f32 %v2343_v5, %v3123_v17  ;;  %v351_v9 = vpop.f32.mrb[11].mxu0  ;;  %2414 = vmatprep.mubr.msk.f32.mxu1 %vm90_vm0, %v732_v63  ;;  %v3174_v10 = vpop.f32.mrb[10].mxu1 }
  0xfd   :  { %2648 = verf.f32 %v596_v4  ;;  %v3177_v12 = vadd.f32 %v3123_v17, %v351_v9  ;;  %2415 = vmatmul.mubr.msk.f32.vlgmr.msra.gmra.mrb[24].mxu1 %vm90_vm0, %v733_v2  ;;  %v3180_v13 = vpop.f32.mrb[11].mxu1  ;;  %v735_v19 = vmul.f32 %v687_v3, %v543_v11  ;;  %v549_v9 = vmul.f32 0.5, %v3159_v56 }
  0xfe   :  { %v2639_v14 = vpop.eup %2638  ;;  %v734_v15 = vmul.f32 %v686_v7, %v542_v6  ;;  %v599_v16 = vmul.f32 0.70710677, %v3171_v8  ;;  %v3233_v56 = vadd.f32 %v3126_v21, %v3123_v17 }
  0xff   :  { %v2641_v18 = vpop.eup %2640  ;;  %v689_v20 = vadd.f32 1.0, %v2639_v14  ;;  %v598_v22 = vmul.f32 0.70710677, %v3177_v12  ;;  %v2346_v24 = vpop.f32.mrb[12].mxu0 }
 0x100   :  { %v688_v26 = vadd.f32 1.0, %v2641_v18  ;;  %2650 = verf.f32 %v599_v16  ;;  %v3185_v27 = vadd.f32 %v2346_v24, %v3123_v17  ;;  %v361_v28 = vpop.f32.mrb[13].mxu0  ;;  %2417 = vmatprep.mubr.msk.f32.mxu1 %vm90_vm0, %v734_v15  ;;  %v3188_v30 = vpop.f32.mrb[12].mxu1 }
 0x101   :  { %2652 = verf.f32 %v598_v22  ;;  %v3192_v33 = vadd.f32 %v3123_v17, %v361_v28  ;;  %2418 = vmatmul.mubr.msk.f32.gmra.mrb[26].mxu1 %vm90_vm0, %v735_v19  ;;  %v3195_v34 = vpop.f32.mrb[13].mxu1  ;;  %v737_v42 = vmul.f32 %v689_v20, %v545_v32 }
 0x102   :  { %v2643_v36 = vpop.eup %2642  ;;  %v736_v38 = vmul.f32 %v688_v26, %v544_v25  ;;  %v601_v40 = vmul.f32 0.70710677, %v3185_v27  ;;  %v550_v25 = vmul.f32 0.5, %v3177_v12 }
 0x103   :  { %v2645_v41 = vpop.eup %2644  ;;  %v691_v44 = vadd.f32 1.0, %v2643_v36  ;;  %v600_v48 = vmul.f32 0.70710677, %v3192_v33  ;;  %v2349_v49 = vpop.f32.mrb[14].mxu0 }
 0x104   :  { %v690_v50 = vadd.f32 1.0, %v2645_v41  ;;  %2654 = verf.f32 %v601_v40  ;;  %v3201_v51 = vadd.f32 %v2349_v49, %v3123_v17  ;;  %v371_v52 = vpop.f32.mrb[15].mxu0  ;;  %2420 = vmatprep.mubr.msk.f32.mxu1 %vm90_vm0, %v736_v38  ;;  %v3204_v53 = vpop.f32.mrb[14].mxu1  ;;  %v551_v38 = vmul.f32 0.5, %v3171_v8 }
 0x105   :  { %2656 = verf.f32 %v600_v48  ;;  %v3208_v55 = vadd.f32 %v3123_v17, %v371_v52  ;;  %2421 = vmatmul.mubr.msk.f32.gmra.mrb[28].mxu1 %vm90_vm0, %v737_v42  ;;  %v3211_v57 = vpop.f32.mrb[15].mxu1  ;;  %v739_v0 = vmul.f32 %v691_v44, %v547_v54  ;;  %v3251_v42 = vadd.f32 %v3123_v17, %v3129_v23 }
 0x106   :  { %v2647_v46 = vpop.eup %2646  ;;  %v738_v59 = vmul.f32 %v690_v50, %v546_v35  ;;  %v603_v62 = vmul.f32 0.70710677, %v3201_v51  ;;  %v613_v8 = vmul.f32 0.70710677, %v3233_v56  ;;  %v552_v54 = vmul.f32 0.5, %v3192_v33 }
 0x107   :  { %v2649_v63 = vpop.eup %2648  ;;  %v693_v1 = vadd.f32 1.0, %v2647_v46  ;;  %v602_v2 = vmul.f32 0.70710677, %v3208_v55  ;;  %v2352_v3 = vpop.f32.mrb[16].mxu0 }
 0x108   :  { %v692_v4 = vadd.f32 1.0, %v2649_v63  ;;  %2658 = verf.f32 %v603_v62  ;;  %v3217_v5 = vadd.f32 %v2352_v3, %v3123_v17  ;;  %v381_v6 = vpop.f32.mrb[17].mxu0  ;;  %2423 = vmatprep.mubr.msk.f32.mxu1 %vm90_vm0, %v738_v59  ;;  %v3220_v7 = vpop.f32.mrb[16].mxu1  ;;  %v553_v63 = vmul.f32 0.5, %v3185_v27 }
 0x109   :  { %2660 = verf.f32 %v602_v2  ;;  %v3224_v11 = vadd.f32 %v3123_v17, %v381_v6  ;;  %2424 = vmatmul.mubr.msk.f32.gmra.mrb[30].mxu1 %vm90_vm0, %v739_v0  ;;  %v3227_v14 = vpop.f32.mrb[17].mxu1  ;;  %v741_v19 = vmul.f32 %v693_v1, %v549_v9  ;;  %v612_v3 = vmul.f32 0.70710677, %v3251_v42 }
 0x10a   :  { %v2651_v60 = vpop.eup %2650  ;;  %v740_v15 = vmul.f32 %v692_v4, %v548_v43  ;;  %v605_v16 = vmul.f32 0.70710677, %v3217_v5  ;;  %v3273_v43 = vadd.f32 %v3123_v17, %v3135_v31 }
 0x10b   :  { %v2653_v18 = vpop.eup %2652  ;;  %v695_v20 = vadd.f32 1.0, %v2651_v60  ;;  %v604_v22 = vmul.f32 0.70710677, %v3224_v11  ;;  %v2355_v24 = vpop.f32.mrb[18].mxu0 }
 0x10c   :  { %v694_v26 = vadd.f32 1.0, %v2653_v18  ;;  %2662 = verf.f32 %v605_v16  ;;  %v3237_v28 = vadd.f32 %v2355_v24, %v3123_v17  ;;  %v391_v32 = vpop.f32.mrb[19].mxu0  ;;  %2426 = vmatprep.mubr.msk.f32.mxu1 %vm90_vm0, %v740_v15  ;;  %v3240_v36 = vpop.f32.mrb[18].mxu1  ;;  %v554_v16 = vmul.f32 0.5, %v3208_v55 }
 0x10d   :  { %2664 = verf.f32 %v604_v22  ;;  %v3244_v40 = vadd.f32 %v3123_v17, %v391_v32  ;;  %2427 = vmatmul.mubr.msk.f32.gmra.mrb[32].mxu1 %vm90_vm0, %v741_v19  ;;  %v3247_v21 = vpop.f32.mrb[19].mxu1  ;;  %v743_v49 = vmul.f32 %v695_v20, %v551_v38  ;;  %v555_v22 = vmul.f32 0.5, %v3201_v51 }
 0x10e   :  { %v2655_v12 = vpop.eup %2654  ;;  %v742_v41 = vmul.f32 %v694_v26, %v550_v25  ;;  %v607_v44 = vmul.f32 0.70710677, %v3237_v28  ;;  %v3287_v24 = vadd.f32 %v3132_v29, %v3123_v17  ;;  %v614_v38 = vmul.f32 0.70710677, %v3273_v43 }
 0x10f   :  { %v2657_v48 = vpop.eup %2656  ;;  %v697_v35 = vadd.f32 1.0, %v2655_v12  ;;  %v606_v50 = vmul.f32 0.70710677, %v3244_v40  ;;  %v2358_v52 = vpop.f32.mrb[20].mxu0  ;;  %v3299_v29 = vadd.f32 %v3123_v17, %v3143_v39 }
 0x110   :  { %v696_v46 = vadd.f32 1.0, %v2657_v48  ;;  %2666 = verf.f32 %v607_v44  ;;  %v3258_v59 = vadd.f32 %v2358_v52, %v3123_v17  ;;  %v401_v62 = vpop.f32.mrb[21].mxu0  ;;  %2429 = vmatprep.mubr.msk.f32.mxu1 %vm90_vm0, %v742_v41  ;;  %v3261_v23 = vpop.f32.mrb[20].mxu1 }
 0x111   :  { %2668 = verf.f32 %v606_v50  ;;  %v3265_v0 = vadd.f32 %v3123_v17, %v401_v62  ;;  %2430 = vmatmul.mubr.msk.f32.gmra.mrb[34].mxu1 %vm90_vm0, %v743_v49  ;;  %v3268_v1 = vpop.f32.mrb[21].mxu1  ;;  %v745_v27 = vmul.f32 %v697_v35, %v553_v63  ;;  %v556_v49 = vmul.f32 0.5, %v3224_v11 }
 0x112   :  { %v2659_v33 = vpop.eup %2658  ;;  %v744_v2 = vmul.f32 %v696_v46, %v552_v54  ;;  %v609_v4 = vmul.f32 0.70710677, %v3258_v59  ;;  %2670 = verf.f32 %v613_v8  ;;  %v557_v8 = vmul.f32 0.5, %v3217_v5 }
 0x113   :  { %v2661_v6 = vpop.eup %2660  ;;  %v699_v9 = vadd.f32 1.0, %v2659_v33  ;;  %v608_v60 = vmul.f32 0.70710677, %v3265_v0  ;;  %v2361_v15 = vpop.f32.mrb[22].mxu0  ;;  %v3307_v50 = vadd.f32 %v3140_v37, %v3123_v17  ;;  %v615_v54 = vmul.f32 0.70710677, %v3287_v24 }
 0x114   :  { %v698_v18 = vadd.f32 1.0, %v2661_v6  ;;  %2672 = verf.f32 %v609_v4  ;;  %v3279_v19 = vadd.f32 %v2361_v15, %v3123_v17  ;;  %v411_v20 = vpop.f32.mrb[23].mxu0  ;;  %2432 = vmatprep.mubr.msk.f32.mxu1 %vm90_vm0, %v744_v2  ;;  %v3282_v31 = vpop.f32.mrb[22].mxu1  ;;  %v3313_v11 = vadd.f32 %v3123_v17, %v3154_v47 }
 0x115   :  { %2674 = verf.f32 %v608_v60  ;;  %v3290_v25 = vadd.f32 %v3123_v17, %v411_v20  ;;  %2433 = vmatmul.mubr.msk.f32.gmra.mrb[36].mxu1 %vm90_vm0, %v745_v27  ;;  %v3293_v55 = vpop.f32.mrb[23].mxu1  ;;  %v747_v41 = vmul.f32 %v699_v9, %v555_v22  ;;  %v616_v5 = vmul.f32 0.70710677, %v3299_v29 }
 0x116   :  { %v2663_v26 = vpop.eup %2662  ;;  %v746_v32 = vmul.f32 %v698_v18, %v554_v16  ;;  %2676 = verf.f32 %v612_v3  ;;  %v611_v12 = vmul.f32 0.70710677, %v3279_v19  ;;  %v558_v37 = vmul.f32 0.5, %v3244_v40 }
 0x117   :  { %v2665_v51 = vpop.eup %2664  ;;  %v701_v44 = vadd.f32 1.0, %v2663_v26  ;;  %v610_v48 = vmul.f32 0.70710677, %v3290_v25  ;;  %v559_v3 = vmul.f32 0.5, %v3237_v28  ;;  %v617_v4 = vmul.f32 0.70710677, %v3307_v50 }
 0x118   :  { %v700_v35 = vadd.f32 1.0, %v2665_v51  ;;  %2678 = verf.f32 %v611_v12  ;;  %2435 = vmatprep.mubr.msk.f32.mxu1 %vm90_vm0, %v746_v32  ;;  %v3323_v27 = vadd.f32 %v3149_v45, %v3123_v17  ;;  %v618_v9 = vmul.f32 0.70710677, %v3313_v11 }
 0x119   :  { %2680 = verf.f32 %v610_v48  ;;  %2436 = vmatmul.mubr.msk.f32.gmra.mrb[38].mxu1 %vm90_vm0, %v747_v41  ;;  %v749_v62 = vmul.f32 %v701_v44, %v557_v8  ;;  %v3328_v28 = vadd.f32 %v3123_v17, %v3166_v61  ;;  %v560_v18 = vmul.f32 0.5, %v3265_v0 }
 0x11a   :  { %v2667_v52 = vpop.eup %2666  ;;  %v748_v39 = vmul.f32 %v700_v35, %v556_v49  ;;  %2682 = verf.f32 %v614_v38  ;;  %v561_v22 = vmul.f32 0.5, %v3258_v59  ;;  %v3335_v45 = vadd.f32 %v3161_v58, %v3123_v17 }
 0x11b   :  { %v2669_v46 = vpop.eup %2668  ;;  %v703_v63 = vadd.f32 1.0, %v2667_v52  ;;  %2684 = verf.f32 %v615_v54  ;;  %v619_v61 = vmul.f32 0.70710677, %v3323_v27  ;;  %v620_v51 = vmul.f32 0.70710677, %v3328_v28 }
 0x11c   :  { %v702_v33 = vadd.f32 1.0, %v2669_v46  ;;  %2438 = vmatprep.mubr.msk.f32.mxu1 %vm90_vm0, %v748_v39  ;;  %v2671_v2 = vpop.eup %2670  ;;  %2686 = verf.f32 %v616_v5  ;;  %v3342_v59 = vadd.f32 %v3123_v17, %v3180_v13  ;;  %v564_v41 = vmul.f32 0.5, %v3251_v42 }
 0x11d   :  { %2439 = vmatmul.mubr.msk.f32.gmra.mrb[40].mxu1 %vm90_vm0, %v749_v62  ;;  %v751_v60 = vmul.f32 %v703_v63, %v559_v3  ;;  %2688 = verf.f32 %v617_v4  ;;  %v562_v44 = vmul.f32 0.5, %v3290_v25  ;;  %v565_v35 = vmul.f32 0.5, %v3233_v56 }
 0x11e   :  { %v2673_v47 = vpop.eup %2672  ;;  %v750_v6 = vmul.f32 %v702_v33, %v558_v37  ;;  %2690 = verf.f32 %v618_v9  ;;  %v563_v8 = vmul.f32 0.5, %v3279_v19  ;;  %v621_v52 = vmul.f32 0.70710677, %v3335_v45 }
 0x11f   :  { %v2675_v40 = vpop.eup %2674  ;;  %v705_v15 = vadd.f32 1.0, %v2673_v47  ;;  %v709_v39 = vadd.f32 1.0, %v2671_v2  ;;  %2692 = verf.f32 %v619_v61  ;;  %v3353_v42 = vadd.f32 %v3174_v10, %v3123_v17 }
 0x120   :  { %v2677_v16 = vpop.eup %2676  ;;  %v704_v20 = vadd.f32 1.0, %v2675_v40  ;;  %2441 = vmatprep.mubr.msk.f32.mxu1 %vm90_vm0, %v750_v6  ;;  %2694 = verf.f32 %v620_v51  ;;  %v622_v54 = vmul.f32 0.70710677, %v3342_v59  ;;  %v3358_v56 = vadd.f32 %v3123_v17, %v3195_v34 }
 0x121   :  { %2442 = vmatmul.mubr.msk.f32.gmra.mrb[42].mxu1 %vm90_vm0, %v751_v60  ;;  %v753_v12 = vmul.f32 %v705_v15, %v561_v22  ;;  %v708_v58 = vadd.f32 1.0, %v2677_v16  ;;  %v566_v62 = vmul.f32 0.5, %v3273_v43  ;;  %2696 = verf.f32 %v621_v52 }
 0x122   :  { %v2679_v26 = vpop.eup %2678  ;;  %v752_v32 = vmul.f32 %v704_v20, %v560_v18  ;;  %v757_v10 = vmul.f32 %v709_v39, %v565_v35  ;;  %v567_v37 = vmul.f32 0.5, %v3287_v24  ;;  %v623_v33 = vmul.f32 0.70710677, %v3353_v42 }
 0x123   :  { %v2681_v38 = vpop.eup %2680  ;;  %v707_v0 = vadd.f32 1.0, %v2679_v26  ;;  %v756_v46 = vmul.f32 %v708_v58, %v564_v41  ;;  %v3367_v34 = vadd.f32 %v3188_v30, %v3123_v17  ;;  %2698 = verf.f32 %v622_v54 }
 0x124   :  { %v706_v48 = vadd.f32 1.0, %v2681_v38  ;;  %2444 = vmatprep.mubr.msk.f32.mxu1 %vm90_vm0, %v752_v32  ;;  %v2683_v49 = vpop.eup %2682  ;;  %v624_v3 = vmul.f32 0.70710677, %v3358_v56  ;;  %v3373_v4 = vadd.f32 %v3123_v17, %v3211_v57  ;;  %v568_v24 = vmul.f32 0.5, %v3299_v29 }
 0x125   :  { %2445 = vmatmul.mubr.msk.f32.gmra.mrb[44].mxu1 %vm90_vm0, %v753_v12  ;;  %v755_v25 = vmul.f32 %v707_v0, %v563_v8  ;;  %v2685_v19 = vpop.eup %2684  ;;  %v710_v63 = vadd.f32 1.0, %v2683_v49  ;;  %v569_v40 = vmul.f32 0.5, %v3307_v50  ;;  %2700 = verf.f32 %v623_v33 }
 0x126   :  { %v754_v13 = vmul.f32 %v706_v48, %v562_v44  ;;  %v2687_v5 = vpop.eup %2686  ;;  %v711_v43 = vadd.f32 1.0, %v2685_v19  ;;  %v625_v60 = vmul.f32 0.70710677, %v3367_v34  ;;  %v3381_v15 = vadd.f32 %v3204_v53, %v3123_v17 }
 0x127   :  { %v2689_v2 = vpop.eup %2688  ;;  %v758_v6 = vmul.f32 %v710_v63, %v566_v62  ;;  %v712_v9 = vadd.f32 1.0, %v2687_v5  ;;  %2702 = verf.f32 %v624_v3  ;;  %v626_v16 = vmul.f32 0.70710677, %v3373_v4 }
 0x128   :  { %2447 = vmatprep.mubr.msk.f32.mxu1 %vm90_vm0, %v754_v13  ;;  %v2691_v47 = vpop.eup %2690  ;;  %v713_v30 = vadd.f32 1.0, %v2689_v2  ;;  %v759_v57 = vmul.f32 %v711_v43, %v567_v37  ;;  %v3387_v29 = vadd.f32 %v3123_v17, %v3227_v14  ;;  %v570_v20 = vmul.f32 0.5, %v3313_v11 }
 0x129   :  { %2448 = vmatmul.mubr.msk.f32.gmra.mrb[46].mxu1 %vm90_vm0, %v755_v25  ;;  %v2693_v50 = vpop.eup %2692  ;;  %v760_v18 = vmul.f32 %v712_v9, %v568_v24  ;;  %v714_v22 = vadd.f32 1.0, %v2691_v47  ;;  %v571_v32 = vmul.f32 0.5, %v3323_v27  ;;  %2704 = verf.f32 %v625_v60 }
 0x12a   :  { %2450 = vmatprep.mubr.msk.f32.mxu1 %vm90_vm0, %v756_v46  ;;  %v2695_v26 = vpop.eup %2694  ;;  %v761_v53 = vmul.f32 %v713_v30, %v569_v40  ;;  %v627_v61 = vmul.f32 0.70710677, %v3381_v15  ;;  %v3395_v38 = vadd.f32 %v3220_v7, %v3123_v17  ;;  %v715_v12 = vadd.f32 1.0, %v2693_v50 }
 0x12b   :  { %v2697_v14 = vpop.eup %2696  ;;  %2706 = verf.f32 %v626_v16  ;;  %v628_v11 = vmul.f32 0.70710677, %v3387_v29  ;;  %v3401_v27 = vadd.f32 %v3123_v17, %v3247_v21  ;;  %v762_v0 = vmul.f32 %v714_v22, %v570_v20 }
 0x12c   :  { %v572_v51 = vmul.f32 0.5, %v3328_v28  ;;  %v716_v41 = vadd.f32 1.0, %v2695_v26  ;;  %v573_v44 = vmul.f32 0.5, %v3335_v45  ;;  %v717_v7 = vadd.f32 1.0, %v2697_v14 }
 0x12d   :  { %2451 = vmatmul.mubr.msk.f32.gmra.mrb[48].mxu1 %vm90_vm0, %v757_v10  ;;  %v2699_v58 = vpop.eup %2698  ;;  %2708 = verf.f32 %v627_v61  ;;  %v629_v48 = vmul.f32 0.70710677, %v3395_v38  ;;  %v3409_v49 = vadd.f32 %v3240_v36, %v3123_v17  ;;  %v763_v21 = vmul.f32 %v715_v12, %v571_v32 }
 0x12e   :  { %2453 = vmatprep.mubr.msk.f32.mxu1 %vm90_vm0, %v758_v6  ;;  %2710 = verf.f32 %v628_v11  ;;  %v630_v28 = vmul.f32 0.70710677, %v3401_v27  ;;  %v3415_v35 = vadd.f32 %v3123_v17, %v3268_v1  ;;  %v764_v8 = vmul.f32 %v716_v41, %v572_v51 }
 0x12f   :  { %v2701_v45 = vpop.eup %2700  ;;  %v574_v52 = vmul.f32 0.5, %v3342_v59  ;;  %v718_v39 = vadd.f32 1.0, %v2699_v58  ;;  %v575_v25 = vmul.f32 0.5, %v3353_v42  ;;  %v765_v36 = vmul.f32 %v717_v7, %v573_v44 }
 0x130   :  { %2712 = verf.f32 %v629_v48  ;;  %v631_v54 = vmul.f32 0.70710677, %v3409_v49  ;;  %v3423_v19 = vadd.f32 %v3261_v23, %v3123_v17  ;;  %v719_v1 = vadd.f32 1.0, %v2701_v45 }
 0x131   :  { %2454 = vmatmul.mubr.msk.f32.gmra.mrb[50].mxu1 %vm90_vm0, %v759_v57  ;;  %v2703_v13 = vpop.eup %2702  ;;  %2714 = verf.f32 %v630_v28  ;;  %v632_v59 = vmul.f32 0.70710677, %v3415_v35  ;;  %v532_v46 = vadd.f32 %v3123_v17, %v3293_v55  ;;  %v766_v62 = vmul.f32 %v718_v39, %v574_v52  ;;  %v1491_v52 = vld [vmem:[%s3948_s5 + $0x38] sm:$0xff] }
 0x132   :  { %2456 = vmatprep.mubr.msk.f32.mxu1 %vm90_vm0, %v760_v18  ;;  %v576_v63 = vmul.f32 0.5, %v3358_v56  ;;  %v720_v5 = vadd.f32 1.0, %v2703_v13  ;;  %v577_v23 = vmul.f32 0.5, %v3367_v34  ;;  %2716 = verf.f32 %v631_v54  ;;  %v3466_v13 = vld [vmem:[%s3950_s4] ss:$0 sm:$0xff] }
 0x133   :  { %v2705_v42 = vpop.eup %2704  ;;  %v633_v37 = vmul.f32 0.70710677, %v3423_v19  ;;  %v537_v33 = vadd.f32 %v3282_v31, %v3123_v17  ;;  %v767_v2 = vmul.f32 %v719_v1, %v575_v25  ;;  %2718 = verf.f32 %v632_v59 }
 0x134   :  { %v721_v55 = vadd.f32 1.0, %v2705_v42  ;;  %v634_v43 = vmul.f32 0.70710677, %v532_v46  ;;  %v768_v56 = vmul.f32 %v720_v5, %v576_v63  ;;  %v578_v47 = vmul.f32 0.5, %v3373_v4 }
 0x135   :  { %2457 = vmatmul.mubr.msk.f32.gmra.mrb[52].mxu1 %vm90_vm0, %v761_v53  ;;  %v2707_v10 = vpop.eup %2706  ;;  %2720 = verf.f32 %v633_v37  ;;  %v635_v34 = vmul.f32 0.70710677, %v537_v33  ;;  %v579_v17 = vmul.f32 0.5, %v3381_v15  ;;  %v580_v60 = vmul.f32 0.5, %v3387_v29 }
 0x136   :  { %2459 = vmatprep.mubr.msk.f32.mxu1 %vm90_vm0, %v762_v0  ;;  %v722_v6 = vadd.f32 1.0, %v2707_v10  ;;  %v769_v9 = vmul.f32 %v721_v55, %v577_v23  ;;  %2722 = verf.f32 %v634_v43  ;;  %v581_v50 = vmul.f32 0.5, %v3395_v38 }
 0x137   :  { %v2709_v3 = vpop.eup %2708  ;;  %2724 = verf.f32 %v635_v34  ;;  %v582_v15 = vmul.f32 0.5, %v3401_v27  ;;  %v583_v53 = vmul.f32 0.5, %v3409_v49  ;;  %v584_v11 = vmul.f32 0.5, %v3415_v35 }
 0x138   :  { %v2711_v24 = vpop.eup %2710  ;;  %v723_v31 = vadd.f32 1.0, %v2709_v3  ;;  %v770_v30 = vmul.f32 %v722_v6, %v578_v47  ;;  %v585_v51 = vmul.f32 0.5, %v3423_v19  ;;  %v586_v7 = vmul.f32 0.5, %v532_v46 }
 0x139   :  { %2460 = vmatmul.mubr.msk.f32.gmra.mrb[54].mxu1 %vm90_vm0, %v763_v21  ;;  %v724_v57 = vadd.f32 1.0, %v2711_v24  ;;  %v587_v21 = vmul.f32 0.5, %v537_v33 }
 0x13a   :  { %2462 = vmatprep.mubr.msk.f32.mxu1 %vm90_vm0, %v764_v8  ;;  %v2713_v40 = vpop.eup %2712  ;;  %v771_v4 = vmul.f32 %v723_v31, %v579_v17  ;;  %v1490_v8 = vld [vmem:[%s3948_s5 + $0x30] sm:$0xff] }
 0x13b   :  { %v2715_v16 = vpop.eup %2714  ;;  %v725_v18 = vadd.f32 1.0, %v2713_v40  ;;  %v772_v22 = vmul.f32 %v724_v57, %v580_v60  ;;  %v2618_v39 = vpack.c.bf16 %v1491_v52, %v1490_v8 }
 0x13c   :  { %v2717_v20 = vpop.eup %2716  ;;  %v726_v26 = vadd.f32 1.0, %v2715_v16 }
 0x13d   :  { %2463 = vmatmul.mubr.msk.f32.gmra.mrb[56].mxu1 %vm90_vm0, %v765_v36  ;;  %v2719_v32 = vpop.eup %2718  ;;  %v773_v29 = vmul.f32 %v725_v18, %v581_v50  ;;  %v727_v61 = vadd.f32 1.0, %v2717_v20  ;;  %2619 = vmatprep.subr.bf16.mxu0 %v2618_v39 }
 0x13e   :  { %2465 = vmatprep.mubr.msk.f32.mxu1 %vm90_vm0, %v766_v62  ;;  %v774_v12 = vmul.f32 %v726_v26, %v582_v15  ;;  %v728_v38 = vadd.f32 1.0, %v2719_v32  ;;  %2621 = vmatpush3.bf16.msra.mxu0 %v2618_v39 }
 0x13f   :  { %v2721_v14 = vpop.eup %2720  ;;  %v775_v27 = vmul.f32 %v727_v61, %v583_v53 }
 0x140   :  { %v2723_v0 = vpop.eup %2722  ;;  %v729_v41 = vadd.f32 1.0, %v2721_v14  ;;  %v776_v44 = vmul.f32 %v728_v38, %v584_v11 }
 0x141   :  { %2466 = vmatmul.mubr.msk.f32.gmra.mrb[58].mxu1 %vm90_vm0, %v767_v2  ;;  %v2725_v58 = vpop.eup %2724  ;;  %v730_v48 = vadd.f32 1.0, %v2723_v0 }
 0x142   :  { %2468 = vmatprep.mubr.msk.f32.mxu1 %vm90_vm0, %v768_v56  ;;  %v777_v49 = vmul.f32 %v729_v41, %v585_v51  ;;  %v731_v28 = vadd.f32 1.0, %v2725_v58 }
 0x143   :  { %v778_v35 = vmul.f32 %v730_v48, %v586_v7 }
 0x144   :  { %v779_v45 = vmul.f32 %v731_v28, %v587_v21 }
 0x145   :  { %2469 = vmatmul.mubr.msk.f32.gmra.mrb[60].mxu1 %vm90_vm0, %v769_v9 }
 0x146   :  { %2471 = vmatprep.mubr.msk.f32.mxu1 %vm90_vm0, %v770_v30 }
 0x149   :  { %2472 = vmatmul.mubr.msk.f32.gmra.mrb[62].mxu1 %vm90_vm0, %v771_v4 }
 0x14a   :  { %2474 = vmatprep.mubr.msk.f32.mxu1 %vm90_vm0, %v772_v22 }
 0x14d   :  { %2475 = vmatmul.mubr.msk.f32.gmra.mrb[64].mxu1 %vm90_vm0, %v773_v29 }
 0x14e   :  { %2477 = vmatprep.mubr.msk.f32.mxu1 %vm90_vm0, %v774_v12 }
 0x151   :  { %2478 = vmatmul.mubr.msk.f32.gmra.mrb[66].mxu1 %vm90_vm0, %v775_v27 }
 0x152   :  { %2480 = vmatprep.mubr.msk.f32.mxu1 %vm90_vm0, %v776_v44 }
 0x155   :  { %2481 = vmatmul.mubr.msk.f32.gmra.mrb[68].mxu1 %vm90_vm0, %v777_v49 }
 0x156   :  { %2483 = vmatprep.mubr.msk.f32.mxu1 %vm90_vm0, %v778_v35 }
 0x159   :  { %2484 = vmatmul.mubr.msk.f32.gmra.mrb[70].mxu1 %vm90_vm0, %v779_v45 }
 0x1d0   :  { %v2416_v25 = vpop.f32.mrb[24].mxu1 }
 0x1d1   :  { %v1011_v36 = vadd.f32 %v2416_v25, %v3466_v13  ;;  %v1005_v54 = vpop.f32.mrb[25].mxu1 }
 0x1d2   :  { %v1006_v19 = vadd.f32 %v3466_v13, %v1005_v54 }
 0x1d3   :  { %v1293_v1 = vmul.f32 0.70710677, %v1011_v36  ;;  %v1245_v4 = vmul.f32 0.5, %v1011_v36 }
 0x1d4   :  { %v1292_v59 = vmul.f32 0.70710677, %v1006_v19  ;;  %v2419_v46 = vpop.f32.mrb[26].mxu1  ;;  %v1244_v30 = vmul.f32 0.5, %v1006_v19 }
 0x1d5   :  { %2726 = verf.f32 %v1293_v1  ;;  %v1021_v42 = vadd.f32 %v2419_v46, %v3466_v13  ;;  %v1015_v62 = vpop.f32.mrb[27].mxu1 }
 0x1d6   :  { %2728 = verf.f32 %v1292_v59  ;;  %v1016_v63 = vadd.f32 %v3466_v13, %v1015_v62 }
 0x1d7   :  { %v1295_v5 = vmul.f32 0.70710677, %v1021_v42  ;;  %v1247_v38 = vmul.f32 0.5, %v1021_v42 }
 0x1d8   :  { %v1294_v10 = vmul.f32 0.70710677, %v1016_v63  ;;  %v2422_v23 = vpop.f32.mrb[28].mxu1  ;;  %v1246_v61 = vmul.f32 0.5, %v1016_v63 }
 0x1d9   :  { %2730 = verf.f32 %v1295_v5  ;;  %v1031_v37 = vadd.f32 %v2422_v23, %v3466_v13  ;;  %v1025_v33 = vpop.f32.mrb[29].mxu1 }
 0x1da   :  { %2732 = verf.f32 %v1294_v10  ;;  %v1026_v2 = vadd.f32 %v3466_v13, %v1025_v33 }
 0x1db   :  { %v1297_v55 = vmul.f32 0.70710677, %v1031_v37  ;;  %v1249_v8 = vmul.f32 0.5, %v1031_v37 }
 0x1dc   :  { %v1296_v43 = vmul.f32 0.70710677, %v1026_v2  ;;  %v2425_v3 = vpop.f32.mrb[30].mxu1  ;;  %v1248_v21 = vmul.f32 0.5, %v1026_v2 }
 0x1dd   :  { %2734 = verf.f32 %v1297_v55  ;;  %v3475_v56 = vadd.f32 %v2425_v3, %v3466_v13  ;;  %v1035_v47 = vpop.f32.mrb[31].mxu1 }
 0x1de   :  { %2736 = verf.f32 %v1296_v43  ;;  %v1036_v6 = vadd.f32 %v3466_v13, %v1035_v47 }
 0x1df   :  { %v2727_v24 = vpop.eup %2726  ;;  %v1299_v34 = vmul.f32 0.70710677, %v3475_v56  ;;  %v1251_v10 = vmul.f32 0.5, %v3475_v56 }
 0x1e0   :  { %v2729_v9 = vpop.eup %2728  ;;  %v1389_v17 = vadd.f32 1.0, %v2727_v24  ;;  %v1298_v31 = vmul.f32 0.70710677, %v1036_v6  ;;  %v2428_v40 = vpop.f32.mrb[32].mxu1  ;;  %v1250_v42 = vmul.f32 0.5, %v1036_v6 }
 0x1e1   :  { %v1388_v60 = vadd.f32 1.0, %v2729_v9  ;;  %2738 = verf.f32 %v1299_v34  ;;  %v3480_v57 = vadd.f32 %v2428_v40, %v3466_v13  ;;  %v1045_v16 = vpop.f32.mrb[33].mxu1 }
 0x1e2   :  { %2740 = verf.f32 %v1298_v31  ;;  %v1046_v50 = vadd.f32 %v3466_v13, %v1045_v16  ;;  %v1437_v26 = vmul.f32 %v1389_v17, %v1245_v4 }
 0x1e3   :  { %v2731_v18 = vpop.eup %2730  ;;  %v1436_v20 = vmul.f32 %v1388_v60, %v1244_v30  ;;  %v1301_v22 = vmul.f32 0.70710677, %v3480_v57  ;;  %v1253_v17 = vmul.f32 0.5, %v3480_v57 }
 0x1e4   :  { %v2733_v15 = vpop.eup %2732  ;;  %v1391_v32 = vadd.f32 1.0, %v2731_v18  ;;  %v1300_v29 = vmul.f32 0.70710677, %v1046_v50  ;;  %v2431_v53 = vpop.f32.mrb[34].mxu1  ;;  %v1252_v24 = vmul.f32 0.5, %v1046_v50 }
 0x1e5   :  { %v1390_v14 = vadd.f32 1.0, %v2733_v15  ;;  %2742 = verf.f32 %v1301_v22  ;;  %v3485_v12 = vadd.f32 %v2431_v53, %v3466_v13  ;;  %v1055_v11 = vpop.f32.mrb[35].mxu1  ;;  %2502 = vmatprep.mubr.msk.f32.mxu0 %vm90_vm0, %v1436_v20 }
 0x1e6   :  { %2744 = verf.f32 %v1300_v29  ;;  %v3489_v0 = vadd.f32 %v3466_v13, %v1055_v11  ;;  %2503 = vmatmul.mubr.msk.f32.vlgmr.msra.gmra.mrb[24].mxu0 %vm90_vm0, %v1437_v26  ;;  %v1439_v44 = vmul.f32 %v1391_v32, %v1247_v38 }
 0x1e7   :  { %v2735_v27 = vpop.eup %2734  ;;  %v1438_v51 = vmul.f32 %v1390_v14, %v1246_v61  ;;  %v1303_v41 = vmul.f32 0.70710677, %v3485_v12  ;;  %v1255_v32 = vmul.f32 0.5, %v3485_v12 }
 0x1e8   :  { %v2737_v58 = vpop.eup %2736  ;;  %v1393_v7 = vadd.f32 1.0, %v2735_v27  ;;  %v1302_v48 = vmul.f32 0.70710677, %v3489_v0  ;;  %v2434_v49 = vpop.f32.mrb[36].mxu1  ;;  %v1254_v22 = vmul.f32 0.5, %v3489_v0 }
 0x1e9   :  { %v1392_v28 = vadd.f32 1.0, %v2737_v58  ;;  %2746 = verf.f32 %v1303_v41  ;;  %v3495_v35 = vadd.f32 %v2434_v49, %v3466_v13  ;;  %v1065_v45 = vpop.f32.mrb[37].mxu1  ;;  %2505 = vmatprep.mubr.msk.f32.mxu0 %vm90_vm0, %v1438_v51 }
 0x1ea   :  { %2748 = verf.f32 %v1302_v48  ;;  %v3499_v52 = vadd.f32 %v3466_v13, %v1065_v45  ;;  %2506 = vmatmul.mubr.msk.f32.gmra.mrb[26].mxu0 %vm90_vm0, %v1439_v44  ;;  %v1441_v19 = vmul.f32 %v1393_v7, %v1249_v8 }
 0x1eb   :  { %v2739_v39 = vpop.eup %2738  ;;  %v1440_v25 = vmul.f32 %v1392_v28, %v1248_v21  ;;  %v1305_v36 = vmul.f32 0.70710677, %v3495_v35  ;;  %v1257_v7 = vmul.f32 0.5, %v3495_v35 }
 0x1ec   :  { %v2741_v54 = vpop.eup %2740  ;;  %v1395_v1 = vadd.f32 1.0, %v2739_v39  ;;  %v1304_v59 = vmul.f32 0.70710677, %v3499_v52  ;;  %v2437_v46 = vpop.f32.mrb[38].mxu1  ;;  %v1256_v41 = vmul.f32 0.5, %v3499_v52 }
 0x1ed   :  { %v1394_v62 = vadd.f32 1.0, %v2741_v54  ;;  %2750 = verf.f32 %v1305_v36  ;;  %v3505_v63 = vadd.f32 %v2437_v46, %v3466_v13  ;;  %v1075_v5 = vpop.f32.mrb[39].mxu1  ;;  %2508 = vmatprep.mubr.msk.f32.mxu0 %vm90_vm0, %v1440_v25 }
 0x1ee   :  { %2752 = verf.f32 %v1304_v59  ;;  %v3510_v23 = vadd.f32 %v3466_v13, %v1075_v5  ;;  %2509 = vmatmul.mubr.msk.f32.gmra.mrb[28].mxu0 %vm90_vm0, %v1441_v19  ;;  %v1443_v43 = vmul.f32 %v1395_v1, %v1251_v10 }
 0x1ef   :  { %v2743_v37 = vpop.eup %2742  ;;  %v1442_v33 = vmul.f32 %v1394_v62, %v1250_v42  ;;  %v1307_v2 = vmul.f32 0.70710677, %v3505_v63  ;;  %v1259_v1 = vmul.f32 0.5, %v3505_v63 }
 0x1f0   :  { %v2745_v55 = vpop.eup %2744  ;;  %v1397_v3 = vadd.f32 1.0, %v2743_v37  ;;  %v1306_v47 = vmul.f32 0.70710677, %v3510_v23  ;;  %v2440_v6 = vpop.f32.mrb[40].mxu1  ;;  %v1258_v36 = vmul.f32 0.5, %v3510_v23 }
 0x1f1   :  { %v1396_v34 = vadd.f32 1.0, %v2745_v55  ;;  %2754 = verf.f32 %v1307_v2  ;;  %v3516_v56 = vadd.f32 %v2440_v6, %v3466_v13  ;;  %v1085_v9 = vpop.f32.mrb[41].mxu1  ;;  %2511 = vmatprep.mubr.msk.f32.mxu0 %vm90_vm0, %v1442_v33 }
 0x1f2   :  { %2756 = verf.f32 %v1306_v47  ;;  %v3521_v31 = vadd.f32 %v3466_v13, %v1085_v9  ;;  %2512 = vmatmul.mubr.msk.f32.gmra.mrb[30].mxu0 %vm90_vm0, %v1443_v43  ;;  %v1445_v4 = vmul.f32 %v1397_v3, %v1253_v17 }
 0x1f3   :  { %v2747_v40 = vpop.eup %2746  ;;  %v1444_v30 = vmul.f32 %v1396_v34, %v1252_v24  ;;  %v1309_v60 = vmul.f32 0.70710677, %v3516_v56  ;;  %v1261_v3 = vmul.f32 0.5, %v3516_v56 }
 0x1f4   :  { %v2749_v16 = vpop.eup %2748  ;;  %v1399_v50 = vadd.f32 1.0, %v2747_v40  ;;  %v1308_v18 = vmul.f32 0.70710677, %v3521_v31  ;;  %v2443_v20 = vpop.f32.mrb[42].mxu1  ;;  %v1260_v2 = vmul.f32 0.5, %v3521_v31 }
 0x1f5   :  { %v1398_v15 = vadd.f32 1.0, %v2749_v16  ;;  %2758 = verf.f32 %v1309_v60  ;;  %v3528_v57 = vadd.f32 %v2443_v20, %v3466_v13  ;;  %v1095_v26 = vpop.f32.mrb[43].mxu1  ;;  %2514 = vmatprep.mubr.msk.f32.mxu0 %vm90_vm0, %v1444_v30 }
 0x1f6   :  { %2760 = verf.f32 %v1308_v18  ;;  %v3533_v29 = vadd.f32 %v3466_v13, %v1095_v26  ;;  %2515 = vmatmul.mubr.msk.f32.gmra.mrb[32].mxu0 %vm90_vm0, %v1445_v4  ;;  %v1447_v38 = vmul.f32 %v1399_v50, %v1255_v32 }
 0x1f7   :  { %v2751_v53 = vpop.eup %2750  ;;  %v1446_v61 = vmul.f32 %v1398_v15, %v1254_v22  ;;  %v1311_v14 = vmul.f32 0.70710677, %v3528_v57  ;;  %v1263_v50 = vmul.f32 0.5, %v3528_v57 }
 0x1f8   :  { %v2753_v11 = vpop.eup %2752  ;;  %v1401_v0 = vadd.f32 1.0, %v2751_v53  ;;  %v1310_v27 = vmul.f32 0.70710677, %v3533_v29  ;;  %v2446_v51 = vpop.f32.mrb[44].mxu1  ;;  %v1262_v60 = vmul.f32 0.5, %v3533_v29 }
 0x1f9   :  { %v1400_v58 = vadd.f32 1.0, %v2753_v11  ;;  %2762 = verf.f32 %v1311_v14  ;;  %v3540_v12 = vadd.f32 %v2446_v51, %v3466_v13  ;;  %v1105_v44 = vpop.f32.mrb[45].mxu1  ;;  %2517 = vmatprep.mubr.msk.f32.mxu0 %vm90_vm0, %v1446_v61 }
 0x1fa   :  { %2764 = verf.f32 %v1310_v27  ;;  %v3545_v48 = vadd.f32 %v3466_v13, %v1105_v44  ;;  %2518 = vmatmul.mubr.msk.f32.gmra.mrb[34].mxu0 %vm90_vm0, %v1447_v38  ;;  %v1449_v8 = vmul.f32 %v1401_v0, %v1257_v7 }
 0x1fb   :  { %v2755_v49 = vpop.eup %2754  ;;  %v1448_v21 = vmul.f32 %v1400_v58, %v1256_v41  ;;  %v1313_v28 = vmul.f32 0.70710677, %v3540_v12  ;;  %v1265_v0 = vmul.f32 0.5, %v3540_v12 }
 0x1fc   :  { %v2757_v45 = vpop.eup %2756  ;;  %v1403_v52 = vadd.f32 1.0, %v2755_v49  ;;  %v1312_v39 = vmul.f32 0.70710677, %v3545_v48  ;;  %v2449_v25 = vpop.f32.mrb[46].mxu1  ;;  %v1264_v14 = vmul.f32 0.5, %v3545_v48 }
 0x1fd   :  { %v1402_v54 = vadd.f32 1.0, %v2757_v45  ;;  %2766 = verf.f32 %v1313_v28  ;;  %v3552_v35 = vadd.f32 %v2449_v25, %v3466_v13  ;;  %v1115_v19 = vpop.f32.mrb[47].mxu1  ;;  %2520 = vmatprep.mubr.msk.f32.mxu0 %vm90_vm0, %v1448_v21 }
 0x1fe   :  { %2768 = verf.f32 %v1312_v39  ;;  %v3557_v59 = vadd.f32 %v3466_v13, %v1115_v19  ;;  %2521 = vmatmul.mubr.msk.f32.gmra.mrb[36].mxu0 %vm90_vm0, %v1449_v8  ;;  %v1451_v10 = vmul.f32 %v1403_v52, %v1259_v1 }
 0x1ff   :  { %v2759_v46 = vpop.eup %2758  ;;  %v1450_v42 = vmul.f32 %v1402_v54, %v1258_v36  ;;  %v1315_v62 = vmul.f32 0.70710677, %v3552_v35  ;;  %v1267_v52 = vmul.f32 0.5, %v3552_v35 }
 0x200   :  { %v2761_v5 = vpop.eup %2760  ;;  %v1405_v23 = vadd.f32 1.0, %v2759_v46  ;;  %v1314_v37 = vmul.f32 0.70710677, %v3557_v59  ;;  %v2452_v33 = vpop.f32.mrb[48].mxu1  ;;  %v1266_v28 = vmul.f32 0.5, %v3557_v59 }
 0x201   :  { %v1404_v55 = vadd.f32 1.0, %v2761_v5  ;;  %2770 = verf.f32 %v1315_v62  ;;  %v3564_v63 = vadd.f32 %v2452_v33, %v3466_v13  ;;  %v1125_v43 = vpop.f32.mrb[49].mxu1  ;;  %2523 = vmatprep.mubr.msk.f32.mxu0 %vm90_vm0, %v1450_v42 }
 0x202   :  { %2772 = verf.f32 %v1314_v37  ;;  %v3569_v47 = vadd.f32 %v3466_v13, %v1125_v43  ;;  %2524 = vmatmul.mubr.msk.f32.gmra.mrb[38].mxu0 %vm90_vm0, %v1451_v10  ;;  %v1453_v17 = vmul.f32 %v1405_v23, %v1261_v3 }
 0x203   :  { %v2763_v6 = vpop.eup %2762  ;;  %v1452_v24 = vmul.f32 %v1404_v55, %v1260_v2  ;;  %v1317_v34 = vmul.f32 0.70710677, %v3564_v63  ;;  %v1269_v23 = vmul.f32 0.5, %v3564_v63 }
 0x204   :  { %v2765_v9 = vpop.eup %2764  ;;  %v1407_v31 = vadd.f32 1.0, %v2763_v6  ;;  %v1316_v40 = vmul.f32 0.70710677, %v3569_v47  ;;  %v2455_v30 = vpop.f32.mrb[50].mxu1  ;;  %v1268_v62 = vmul.f32 0.5, %v3569_v47 }
 0x205   :  { %v1406_v16 = vadd.f32 1.0, %v2765_v9  ;;  %2774 = verf.f32 %v1317_v34  ;;  %v3576_v56 = vadd.f32 %v2455_v30, %v3466_v13  ;;  %v1135_v4 = vpop.f32.mrb[51].mxu1  ;;  %2526 = vmatprep.mubr.msk.f32.mxu0 %vm90_vm0, %v1452_v24 }
 0x206   :  { %2776 = verf.f32 %v1316_v40  ;;  %v3581_v18 = vadd.f32 %v3466_v13, %v1135_v4  ;;  %2527 = vmatmul.mubr.msk.f32.gmra.mrb[40].mxu0 %vm90_vm0, %v1453_v17  ;;  %v1455_v32 = vmul.f32 %v1407_v31, %v1263_v50 }
 0x207   :  { %v2767_v20 = vpop.eup %2766  ;;  %v1454_v22 = vmul.f32 %v1406_v16, %v1262_v60  ;;  %v1319_v15 = vmul.f32 0.70710677, %v3576_v56  ;;  %v1271_v31 = vmul.f32 0.5, %v3576_v56 }
 0x208   :  { %v2769_v26 = vpop.eup %2768  ;;  %v1409_v29 = vadd.f32 1.0, %v2767_v20  ;;  %v1318_v53 = vmul.f32 0.70710677, %v3581_v18  ;;  %v2458_v61 = vpop.f32.mrb[52].mxu1  ;;  %v1270_v34 = vmul.f32 0.5, %v3581_v18 }
 0x209   :  { %v1408_v11 = vadd.f32 1.0, %v2769_v26  ;;  %2778 = verf.f32 %v1319_v15  ;;  %v3588_v57 = vadd.f32 %v2458_v61, %v3466_v13  ;;  %v1145_v38 = vpop.f32.mrb[53].mxu1  ;;  %2529 = vmatprep.mubr.msk.f32.mxu0 %vm90_vm0, %v1454_v22 }
 0x20a   :  { %2780 = verf.f32 %v1318_v53  ;;  %v3593_v27 = vadd.f32 %v3466_v13, %v1145_v38  ;;  %2530 = vmatmul.mubr.msk.f32.gmra.mrb[42].mxu0 %vm90_vm0, %v1455_v32  ;;  %v1457_v7 = vmul.f32 %v1409_v29, %v1265_v0 }
 0x20b   :  { %v2771_v51 = vpop.eup %2770  ;;  %v1456_v41 = vmul.f32 %v1408_v11, %v1264_v14  ;;  %v1321_v58 = vmul.f32 0.70710677, %v3588_v57  ;;  %v1273_v29 = vmul.f32 0.5, %v3588_v57 }
 0x20c   :  { %v2773_v44 = vpop.eup %2772  ;;  %v1411_v48 = vadd.f32 1.0, %v2771_v51  ;;  %v1320_v49 = vmul.f32 0.70710677, %v3593_v27  ;;  %v2461_v21 = vpop.f32.mrb[54].mxu1  ;;  %v1272_v15 = vmul.f32 0.5, %v3593_v27 }
 0x20d   :  { %v1410_v45 = vadd.f32 1.0, %v2773_v44  ;;  %2782 = verf.f32 %v1321_v58  ;;  %v3600_v12 = vadd.f32 %v2461_v21, %v3466_v13  ;;  %v1155_v8 = vpop.f32.mrb[55].mxu1  ;;  %2532 = vmatprep.mubr.msk.f32.mxu0 %vm90_vm0, %v1456_v41 }
 0x20e   :  { %2784 = verf.f32 %v1320_v49  ;;  %v3605_v39 = vadd.f32 %v3466_v13, %v1155_v8  ;;  %2533 = vmatmul.mubr.msk.f32.gmra.mrb[44].mxu0 %vm90_vm0, %v1457_v7  ;;  %v1459_v1 = vmul.f32 %v1411_v48, %v1267_v52 }
 0x20f   :  { %v2775_v25 = vpop.eup %2774  ;;  %v1458_v36 = vmul.f32 %v1410_v45, %v1266_v28  ;;  %v1323_v54 = vmul.f32 0.70710677, %v3600_v12  ;;  %v1275_v48 = vmul.f32 0.5, %v3600_v12 }
 0x210   :  { %v2777_v19 = vpop.eup %2776  ;;  %v1413_v59 = vadd.f32 1.0, %v2775_v25  ;;  %v1322_v46 = vmul.f32 0.70710677, %v3605_v39  ;;  %v2464_v42 = vpop.f32.mrb[56].mxu1  ;;  %v1274_v58 = vmul.f32 0.5, %v3605_v39 }
 0x211   :  { %v1412_v5 = vadd.f32 1.0, %v2777_v19  ;;  %2786 = verf.f32 %v1323_v54  ;;  %v3612_v35 = vadd.f32 %v2464_v42, %v3466_v13  ;;  %v1165_v10 = vpop.f32.mrb[57].mxu1  ;;  %2535 = vmatprep.mubr.msk.f32.mxu0 %vm90_vm0, %v1458_v36 }
 0x212   :  { %2788 = verf.f32 %v1322_v46  ;;  %v3617_v37 = vadd.f32 %v3466_v13, %v1165_v10  ;;  %2536 = vmatmul.mubr.msk.f32.gmra.mrb[46].mxu0 %vm90_vm0, %v1459_v1  ;;  %v1461_v3 = vmul.f32 %v1413_v59, %v1269_v23 }
 0x213   :  { %v2779_v33 = vpop.eup %2778  ;;  %v1460_v2 = vmul.f32 %v1412_v5, %v1268_v62  ;;  %v1325_v55 = vmul.f32 0.70710677, %v3612_v35  ;;  %v1277_v59 = vmul.f32 0.5, %v3612_v35 }
 0x214   :  { %v2781_v43 = vpop.eup %2780  ;;  %v1415_v47 = vadd.f32 1.0, %v2779_v33  ;;  %v1324_v6 = vmul.f32 0.70710677, %v3617_v37  ;;  %v2467_v24 = vpop.f32.mrb[58].mxu1  ;;  %v1276_v54 = vmul.f32 0.5, %v3617_v37 }
 0x215   :  { %v1414_v9 = vadd.f32 1.0, %v2781_v43  ;;  %2790 = verf.f32 %v1325_v55  ;;  %v3624_v63 = vadd.f32 %v2467_v24, %v3466_v13  ;;  %v1175_v17 = vpop.f32.mrb[59].mxu1  ;;  %2538 = vmatprep.mubr.msk.f32.mxu0 %vm90_vm0, %v1460_v2 }
 0x216   :  { %2792 = verf.f32 %v1324_v6  ;;  %v3629_v40 = vadd.f32 %v3466_v13, %v1175_v17  ;;  %2539 = vmatmul.mubr.msk.f32.gmra.mrb[48].mxu0 %vm90_vm0, %v1461_v3  ;;  %v1463_v50 = vmul.f32 %v1415_v47, %v1271_v31 }
 0x217   :  { %v2783_v30 = vpop.eup %2782  ;;  %v1462_v60 = vmul.f32 %v1414_v9, %v1270_v34  ;;  %v1327_v16 = vmul.f32 0.70710677, %v3624_v63  ;;  %v1279_v47 = vmul.f32 0.5, %v3624_v63 }
 0x218   :  { %v2785_v4 = vpop.eup %2784  ;;  %v1417_v18 = vadd.f32 1.0, %v2783_v30  ;;  %v1326_v20 = vmul.f32 0.70710677, %v3629_v40  ;;  %v2470_v22 = vpop.f32.mrb[60].mxu1  ;;  %v1278_v55 = vmul.f32 0.5, %v3629_v40 }
 0x219   :  { %v1416_v26 = vadd.f32 1.0, %v2785_v4  ;;  %2794 = verf.f32 %v1327_v16  ;;  %v3636_v56 = vadd.f32 %v2470_v22, %v3466_v13  ;;  %v1185_v32 = vpop.f32.mrb[61].mxu1  ;;  %2541 = vmatprep.mubr.msk.f32.mxu0 %vm90_vm0, %v1462_v60 }
 0x21a   :  { %2796 = verf.f32 %v1326_v20  ;;  %v3641_v53 = vadd.f32 %v3466_v13, %v1185_v32  ;;  %2542 = vmatmul.mubr.msk.f32.gmra.mrb[50].mxu0 %vm90_vm0, %v1463_v50  ;;  %v1465_v0 = vmul.f32 %v1417_v18, %v1273_v29 }
 0x21b   :  { %v2787_v61 = vpop.eup %2786  ;;  %v1464_v14 = vmul.f32 %v1416_v26, %v1272_v15  ;;  %v1329_v11 = vmul.f32 0.70710677, %v3636_v56  ;;  %v1281_v18 = vmul.f32 0.5, %v3636_v56 }
 0x21c   :  { %v2789_v38 = vpop.eup %2788  ;;  %v1419_v27 = vadd.f32 1.0, %v2787_v61  ;;  %v1328_v51 = vmul.f32 0.70710677, %v3641_v53  ;;  %v2473_v41 = vpop.f32.mrb[62].mxu1  ;;  %v1280_v16 = vmul.f32 0.5, %v3641_v53 }
 0x21d   :  { %v1418_v44 = vadd.f32 1.0, %v2789_v38  ;;  %2798 = verf.f32 %v1329_v11  ;;  %v3648_v57 = vadd.f32 %v2473_v41, %v3466_v13  ;;  %v1195_v7 = vpop.f32.mrb[63].mxu1  ;;  %2544 = vmatprep.mubr.msk.f32.mxu0 %vm90_vm0, %v1464_v14 }
 0x21e   :  { %2800 = verf.f32 %v1328_v51  ;;  %v3653_v49 = vadd.f32 %v3466_v13, %v1195_v7  ;;  %2545 = vmatmul.mubr.msk.f32.gmra.mrb[52].mxu0 %vm90_vm0, %v1465_v0  ;;  %v1467_v52 = vmul.f32 %v1419_v27, %v1275_v48 }
 0x21f   :  { %v2791_v21 = vpop.eup %2790  ;;  %v1466_v28 = vmul.f32 %v1418_v44, %v1274_v58  ;;  %v1331_v45 = vmul.f32 0.70710677, %v3648_v57  ;;  %v1283_v27 = vmul.f32 0.5, %v3648_v57 }
 0x220   :  { %v2793_v8 = vpop.eup %2792  ;;  %v1421_v39 = vadd.f32 1.0, %v2791_v21  ;;  %v1330_v25 = vmul.f32 0.70710677, %v3653_v49  ;;  %v2476_v36 = vpop.f32.mrb[64].mxu1  ;;  %v1282_v11 = vmul.f32 0.5, %v3653_v49 }
 0x221   :  { %v1420_v19 = vadd.f32 1.0, %v2793_v8  ;;  %2802 = verf.f32 %v1331_v45  ;;  %v3660_v12 = vadd.f32 %v2476_v36, %v3466_v13  ;;  %v1205_v1 = vpop.f32.mrb[65].mxu1  ;;  %2547 = vmatprep.mubr.msk.f32.mxu0 %vm90_vm0, %v1466_v28 }
 0x222   :  { %2804 = verf.f32 %v1330_v25  ;;  %v1206_v46 = vadd.f32 %v3466_v13, %v1205_v1  ;;  %2548 = vmatmul.mubr.msk.f32.gmra.mrb[54].mxu0 %vm90_vm0, %v1467_v52  ;;  %v1469_v23 = vmul.f32 %v1421_v39, %v1277_v59 }
 0x223   :  { %v2795_v42 = vpop.eup %2794  ;;  %v1468_v62 = vmul.f32 %v1420_v19, %v1276_v54  ;;  %v1333_v5 = vmul.f32 0.70710677, %v3660_v12  ;;  %v1285_v8 = vmul.f32 0.5, %v3660_v12 }
 0x224   :  { %v2797_v10 = vpop.eup %2796  ;;  %v1423_v37 = vadd.f32 1.0, %v2795_v42  ;;  %v1332_v33 = vmul.f32 0.70710677, %v1206_v46  ;;  %v2479_v2 = vpop.f32.mrb[66].mxu1  ;;  %v1284_v28 = vmul.f32 0.5, %v1206_v46 }
 0x225   :  { %v1422_v43 = vadd.f32 1.0, %v2797_v10  ;;  %2806 = verf.f32 %v1333_v5  ;;  %v3669_v35 = vadd.f32 %v2479_v2, %v3466_v13  ;;  %v1215_v3 = vpop.f32.mrb[67].mxu1  ;;  %2550 = vmatprep.mubr.msk.f32.mxu0 %vm90_vm0, %v1468_v62 }
 0x226   :  { %2808 = verf.f32 %v1332_v33  ;;  %v1216_v6 = vadd.f32 %v3466_v13, %v1215_v3  ;;  %2551 = vmatmul.mubr.msk.f32.gmra.mrb[56].mxu0 %vm90_vm0, %v1469_v23  ;;  %v1471_v31 = vmul.f32 %v1423_v37, %v1279_v47 }
 0x227   :  { %v2799_v24 = vpop.eup %2798  ;;  %v1470_v34 = vmul.f32 %v1422_v43, %v1278_v55  ;;  %v1335_v9 = vmul.f32 0.70710677, %v3669_v35  ;;  %v1287_v19 = vmul.f32 0.5, %v3669_v35 }
 0x228   :  { %v2801_v17 = vpop.eup %2800  ;;  %v1425_v40 = vadd.f32 1.0, %v2799_v24  ;;  %v1334_v30 = vmul.f32 0.70710677, %v1216_v6  ;;  %v2482_v60 = vpop.f32.mrb[68].mxu1  ;;  %v1286_v36 = vmul.f32 0.5, %v1216_v6  ;;  %v3703_v24 = vstv %s3951_s6 }
 0x229   :  { %v1424_v4 = vadd.f32 1.0, %v2801_v17  ;;  %2810 = verf.f32 %v1335_v9  ;;  %v1231_v63 = vadd.f32 %v2482_v60, %v3466_v13  ;;  %v1225_v50 = vpop.f32.mrb[69].mxu1  ;;  %2553 = vmatprep.mubr.msk.f32.mxu0 %vm90_vm0, %v1470_v34 }
 0x22a   :  { %2812 = verf.f32 %v1334_v30  ;;  %v1226_v20 = vadd.f32 %v3466_v13, %v1225_v50  ;;  %2554 = vmatmul.mubr.msk.f32.gmra.mrb[58].mxu0 %vm90_vm0, %v1471_v31  ;;  %v1473_v29 = vmul.f32 %v1425_v40, %v1281_v18 }
 0x22b   :  { %v2803_v22 = vpop.eup %2802  ;;  %v1472_v15 = vmul.f32 %v1424_v4, %v1280_v16  ;;  %v1337_v26 = vmul.f32 0.70710677, %v1231_v63  ;;  %v1289_v10 = vmul.f32 0.5, %v1231_v63 }
 0x22c   :  { %v2805_v32 = vpop.eup %2804  ;;  %v1427_v53 = vadd.f32 1.0, %v2803_v22  ;;  %v1336_v61 = vmul.f32 0.70710677, %v1226_v20  ;;  %v2485_v14 = vpop.f32.mrb[70].mxu1  ;;  %v1288_v62 = vmul.f32 0.5, %v1226_v20 }
 0x22d   :  { %v1426_v38 = vadd.f32 1.0, %v2805_v32  ;;  %2814 = verf.f32 %v1337_v26  ;;  %v1241_v0 = vadd.f32 %v2485_v14, %v3466_v13  ;;  %v1235_v56 = vpop.f32.mrb[71].mxu1  ;;  %2556 = vmatprep.mubr.msk.f32.mxu0 %vm90_vm0, %v1472_v15 }
 0x22e   :  { %2816 = verf.f32 %v1336_v61  ;;  %v1236_v51 = vadd.f32 %v3466_v13, %v1235_v56  ;;  %2557 = vmatmul.mubr.msk.f32.gmra.mrb[60].mxu0 %vm90_vm0, %v1473_v29  ;;  %v1475_v48 = vmul.f32 %v1427_v53, %v1283_v27 }
 0x22f   :  { %v2807_v41 = vpop.eup %2806  ;;  %v1474_v58 = vmul.f32 %v1426_v38, %v1282_v11  ;;  %v1339_v44 = vmul.f32 0.70710677, %v1241_v0  ;;  %v1291_v3 = vmul.f32 0.5, %v1241_v0 }
 0x230   :  { %v2809_v7 = vpop.eup %2808  ;;  %v1429_v49 = vadd.f32 1.0, %v2807_v41  ;;  %v1338_v21 = vmul.f32 0.70710677, %v1236_v51  ;;  %v1290_v43 = vmul.f32 0.5, %v1236_v51 }
 0x231   :  { %v1428_v45 = vadd.f32 1.0, %v2809_v7  ;;  %2818 = verf.f32 %v1339_v44  ;;  %2559 = vmatprep.mubr.msk.f32.mxu0 %vm90_vm0, %v1474_v58 }
 0x232   :  { %2820 = verf.f32 %v1338_v21  ;;  %2560 = vmatmul.mubr.msk.f32.gmra.mrb[62].mxu0 %vm90_vm0, %v1475_v48  ;;  %v1477_v39 = vmul.f32 %v1429_v49, %v1285_v8 }
 0x233   :  { %v2811_v13 = vpop.eup %2810  ;;  %v1476_v57 = vmul.f32 %v1428_v45, %v1284_v28 }
 0x234   :  { %v2813_v52 = vpop.eup %2812  ;;  %v1431_v25 = vadd.f32 1.0, %v2811_v13 }
 0x235   :  { %v1430_v54 = vadd.f32 1.0, %v2813_v52  ;;  %2562 = vmatprep.mubr.msk.f32.mxu0 %vm90_vm0, %v1476_v57 }
 0x236   :  { %2563 = vmatmul.mubr.msk.f32.gmra.mrb[64].mxu0 %vm90_vm0, %v1477_v39  ;;  %v1479_v12 = vmul.f32 %v1431_v25, %v1287_v19 }
 0x237   :  { %v2815_v1 = vpop.eup %2814  ;;  %v1478_v59 = vmul.f32 %v1430_v54, %v1286_v36 }
 0x238   :  { %v2817_v46 = vpop.eup %2816  ;;  %v1433_v42 = vadd.f32 1.0, %v2815_v1 }
 0x239   :  { %v1432_v5 = vadd.f32 1.0, %v2817_v46  ;;  %2565 = vmatprep.mubr.msk.f32.mxu0 %vm90_vm0, %v1478_v59 }
 0x23a   :  { %2566 = vmatmul.mubr.msk.f32.gmra.mrb[66].mxu0 %vm90_vm0, %v1479_v12  ;;  %v1481_v2 = vmul.f32 %v1433_v42, %v1289_v10 }
 0x23b   :  { %v2819_v23 = vpop.eup %2818  ;;  %v1480_v37 = vmul.f32 %v1432_v5, %v1288_v62 }
 0x23c   :  { %v2821_v33 = vpop.eup %2820  ;;  %v1435_v55 = vadd.f32 1.0, %v2819_v23 }
 0x23d   :  { %v1434_v35 = vadd.f32 1.0, %v2821_v33  ;;  %2568 = vmatprep.mubr.msk.f32.mxu0 %vm90_vm0, %v1480_v37 }
 0x23e   :  { %2569 = vmatmul.mubr.msk.f32.gmra.mrb[68].mxu0 %vm90_vm0, %v1481_v2  ;;  %v1483_v6 = vmul.f32 %v1435_v55, %v1291_v3 }
 0x23f   :  { %v1482_v47 = vmul.f32 %v1434_v35, %v1290_v43 }
 0x241   :  { %2571 = vmatprep.mubr.msk.f32.mxu0 %vm90_vm0, %v1482_v47 }
 0x242   :  { %2572 = vmatmul.mubr.msk.f32.gmra.mrb[70].mxu0 %vm90_vm0, %v1483_v6 }
 0x2b9   :  { %v2504_v34 = vpop.f32.mrb[24].mxu0 }
 0x2ba   :  { %v1710_v9 = vadd.f32 %v2504_v34, %v3703_v24  ;;  %v1704_v17 = vpop.f32.mrb[25].mxu0 }
 0x2bb   :  { %v1705_v31 = vadd.f32 %v1704_v17, %v3703_v24 }
 0x2bc   :  { %1945 = vst.msk [vmem:[%s3952_s7 + $0x8] sm:$0xff] %vm1943_vm1, %v1710_v9 }
 0x2bd   :  { %1944 = vst.msk [vmem:[%s3952_s7] sm:$0xff] %vm1943_vm1, %v1705_v31  ;;  %v2507_v40 = vpop.f32.mrb[26].mxu0 }
 0x2be   :  { %v1720_v30 = vadd.f32 %v2507_v40, %v3703_v24  ;;  %v1714_v60 = vpop.f32.mrb[27].mxu0 }
 0x2bf   :  { %v1715_v16 = vadd.f32 %v1714_v60, %v3703_v24 }
 0x2c0   :  { %1947 = vst.msk [vmem:[%s3952_s7 + $0x18] sm:$0xff] %vm1943_vm1, %v1720_v30 }
 0x2c1   :  { %1946 = vst.msk [vmem:[%s3952_s7 + $0x10] sm:$0xff] %vm1943_vm1, %v1715_v16  ;;  %v2510_v4 = vpop.f32.mrb[28].mxu0 }
 0x2c2   :  { %v1730_v63 = vadd.f32 %v2510_v4, %v3703_v24  ;;  %v1724_v50 = vpop.f32.mrb[29].mxu0 }
 0x2c3   :  { %v1725_v18 = vadd.f32 %v1724_v50, %v3703_v24 }
 0x2c4   :  { %1949 = vst.msk [vmem:[%s3952_s7 + $0x28] sm:$0xff] %vm1943_vm1, %v1730_v63 }
 0x2c5   :  { %1948 = vst.msk [vmem:[%s3952_s7 + $0x20] sm:$0xff] %vm1943_vm1, %v1725_v18  ;;  %v2513_v20 = vpop.f32.mrb[30].mxu0 }
 0x2c6   :  { %v1740_v22 = vadd.f32 %v2513_v20, %v3703_v24  ;;  %v1734_v15 = vpop.f32.mrb[31].mxu0 }
 0x2c7   :  { %v1735_v26 = vadd.f32 %v1734_v15, %v3703_v24 }
 0x2c8   :  { %1951 = vst.msk [vmem:[%s3952_s7 + $0x38] sm:$0xff] %vm1943_vm1, %v1740_v22 }
 0x2c9   :  { %1950 = vst.msk [vmem:[%s3952_s7 + $0x30] sm:$0xff] %vm1943_vm1, %v1735_v26  ;;  %v2516_v32 = vpop.f32.mrb[32].mxu0 }
 0x2ca   :  { %v1750_v29 = vadd.f32 %v2516_v32, %v3703_v24  ;;  %v1744_v53 = vpop.f32.mrb[33].mxu0 }
 0x2cb   :  { %v1745_v61 = vadd.f32 %v1744_v53, %v3703_v24 }
 0x2cc   :  { %1953 = vst.msk [vmem:[%s3952_s7 + $0x48] sm:$0xff] %vm1943_vm1, %v1750_v29 }
 0x2cd   :  { %1952 = vst.msk [vmem:[%s3952_s7 + $0x40] sm:$0xff] %vm1943_vm1, %v1745_v61  ;;  %v2519_v14 = vpop.f32.mrb[34].mxu0 }
 0x2ce   :  { %v1760_v11 = vadd.f32 %v2519_v14, %v3703_v24  ;;  %v1754_v38 = vpop.f32.mrb[35].mxu0 }
 0x2cf   :  { %v1755_v0 = vadd.f32 %v1754_v38, %v3703_v24 }
 0x2d0   :  { %1955 = vst.msk [vmem:[%s3952_s7 + $0x58] sm:$0xff] %vm1943_vm1, %v1760_v11 }
 0x2d1   :  { %1954 = vst.msk [vmem:[%s3952_s7 + $0x50] sm:$0xff] %vm1943_vm1, %v1755_v0  ;;  %v2522_v56 = vpop.f32.mrb[36].mxu0 }
 0x2d2   :  { %v1770_v27 = vadd.f32 %v2522_v56, %v3703_v24  ;;  %v1764_v51 = vpop.f32.mrb[37].mxu0 }
 0x2d3   :  { %v1765_v41 = vadd.f32 %v1764_v51, %v3703_v24 }
 0x2d4   :  { %1957 = vst.msk [vmem:[%s3952_s7 + $0x68] sm:$0xff] %vm1943_vm1, %v1770_v27 }
 0x2d5   :  { %1956 = vst.msk [vmem:[%s3952_s7 + $0x60] sm:$0xff] %vm1943_vm1, %v1765_v41  ;;  %v2525_v58 = vpop.f32.mrb[38].mxu0 }
 0x2d6   :  { %v1780_v44 = vadd.f32 %v2525_v58, %v3703_v24  ;;  %v1774_v7 = vpop.f32.mrb[39].mxu0 }
 0x2d7   :  { %v1775_v48 = vadd.f32 %v1774_v7, %v3703_v24 }
 0x2d8   :  { %1959 = vst.msk [vmem:[%s3952_s7 + $0x78] sm:$0xff] %vm1943_vm1, %v1780_v44 }
 0x2d9   :  { %1958 = vst.msk [vmem:[%s3952_s7 + $0x70] sm:$0xff] %vm1943_vm1, %v1775_v48  ;;  %v2528_v49 = vpop.f32.mrb[40].mxu0 }
 0x2da   :  { %v1790_v21 = vadd.f32 %v2528_v49, %v3703_v24  ;;  %v1784_v28 = vpop.f32.mrb[41].mxu0 }
 0x2db   :  { %v1785_v45 = vadd.f32 %v1784_v28, %v3703_v24 }
 0x2dc   :  { %1961 = vst.msk [vmem:[%s3952_s7 + $0x88] sm:$0xff] %vm1943_vm1, %v1790_v21 }
 0x2dd   :  { %1960 = vst.msk [vmem:[%s3952_s7 + $0x80] sm:$0xff] %vm1943_vm1, %v1785_v45  ;;  %v2531_v8 = vpop.f32.mrb[42].mxu0 }
 0x2de   :  { %v1800_v13 = vadd.f32 %v2531_v8, %v3703_v24  ;;  %v1794_v57 = vpop.f32.mrb[43].mxu0 }
 0x2df   :  { %v1795_v52 = vadd.f32 %v1794_v57, %v3703_v24 }
 0x2e0   :  { %1963 = vst.msk [vmem:[%s3952_s7 + $0x98] sm:$0xff] %vm1943_vm1, %v1800_v13 }
 0x2e1   :  { %1962 = vst.msk [vmem:[%s3952_s7 + $0x90] sm:$0xff] %vm1943_vm1, %v1795_v52  ;;  %v2534_v39 = vpop.f32.mrb[44].mxu0 }
 0x2e2   :  { %v1810_v25 = vadd.f32 %v2534_v39, %v3703_v24  ;;  %v1804_v36 = vpop.f32.mrb[45].mxu0 }
 0x2e3   :  { %v1805_v54 = vadd.f32 %v1804_v36, %v3703_v24 }
 0x2e4   :  { %1965 = vst.msk [vmem:[%s3952_s7 + $0xa8] sm:$0xff] %vm1943_vm1, %v1810_v25 }
 0x2e5   :  { %1964 = vst.msk [vmem:[%s3952_s7 + $0xa0] sm:$0xff] %vm1943_vm1, %v1805_v54  ;;  %v2537_v19 = vpop.f32.mrb[46].mxu0 }
 0x2e6   :  { %v1820_v1 = vadd.f32 %v2537_v19, %v3703_v24  ;;  %v1814_v59 = vpop.f32.mrb[47].mxu0 }
 0x2e7   :  { %v1815_v46 = vadd.f32 %v1814_v59, %v3703_v24 }
 0x2e8   :  { %1967 = vst.msk [vmem:[%s3952_s7 + $0xb8] sm:$0xff] %vm1943_vm1, %v1820_v1 }
 0x2e9   :  { %1966 = vst.msk [vmem:[%s3952_s7 + $0xb0] sm:$0xff] %vm1943_vm1, %v1815_v46  ;;  %v2540_v12 = vpop.f32.mrb[48].mxu0 }
 0x2ea   :  { %v1830_v42 = vadd.f32 %v2540_v12, %v3703_v24  ;;  %v1824_v62 = vpop.f32.mrb[49].mxu0 }
 0x2eb   :  { %v1825_v5 = vadd.f32 %v1824_v62, %v3703_v24 }
 0x2ec   :  { %1969 = vst.msk [vmem:[%s3952_s7 + $0xc8] sm:$0xff] %vm1943_vm1, %v1830_v42 }
 0x2ed   :  { %1968 = vst.msk [vmem:[%s3952_s7 + $0xc0] sm:$0xff] %vm1943_vm1, %v1825_v5  ;;  %v2543_v10 = vpop.f32.mrb[50].mxu0 }
 0x2ee   :  { %v1840_v23 = vadd.f32 %v2543_v10, %v3703_v24  ;;  %v1834_v37 = vpop.f32.mrb[51].mxu0 }
 0x2ef   :  { %v1835_v33 = vadd.f32 %v1834_v37, %v3703_v24 }
 0x2f0   :  { %1971 = vst.msk [vmem:[%s3952_s7 + $0xd8] sm:$0xff] %vm1943_vm1, %v1840_v23 }
 0x2f1   :  { %1970 = vst.msk [vmem:[%s3952_s7 + $0xd0] sm:$0xff] %vm1943_vm1, %v1835_v33  ;;  %v2546_v2 = vpop.f32.mrb[52].mxu0 }
 0x2f2   :  { %v1850_v55 = vadd.f32 %v2546_v2, %v3703_v24  ;;  %v1844_v43 = vpop.f32.mrb[53].mxu0 }
 0x2f3   :  { %v1845_v35 = vadd.f32 %v1844_v43, %v3703_v24 }
 0x2f4   :  { %1973 = vst.msk [vmem:[%s3952_s7 + $0xe8] sm:$0xff] %vm1943_vm1, %v1850_v55 }
 0x2f5   :  { %1972 = vst.msk [vmem:[%s3952_s7 + $0xe0] sm:$0xff] %vm1943_vm1, %v1845_v35  ;;  %v2549_v3 = vpop.f32.mrb[54].mxu0 }
 0x2f6   :  { %v1860_v47 = vadd.f32 %v2549_v3, %v3703_v24  ;;  %v1854_v6 = vpop.f32.mrb[55].mxu0 }
 0x2f7   :  { %v1855_v34 = vadd.f32 %v1854_v6, %v3703_v24 }
 0x2f8   :  { %1975 = vst.msk [vmem:[%s3952_s7 + $0xf8] sm:$0xff] %vm1943_vm1, %v1860_v47 }
 0x2f9   :  { %1974 = vst.msk [vmem:[%s3952_s7 + $0xf0] sm:$0xff] %vm1943_vm1, %v1855_v34  ;;  %v2552_v9 = vpop.f32.mrb[56].mxu0 }
 0x2fa   :  { %v1870_v17 = vadd.f32 %v2552_v9, %v3703_v24  ;;  %v1864_v31 = vpop.f32.mrb[57].mxu0 }
 0x2fb   :  { %v1865_v40 = vadd.f32 %v1864_v31, %v3703_v24 }
 0x2fc   :  { %1977 = vst.msk [vmem:[%s3952_s7 + $0x108] sm:$0xff] %vm1943_vm1, %v1870_v17 }
 0x2fd   :  { %1976 = vst.msk [vmem:[%s3952_s7 + $0x100] sm:$0xff] %vm1943_vm1, %v1865_v40  ;;  %v2555_v30 = vpop.f32.mrb[58].mxu0 }
 0x2fe   :  { %v1880_v60 = vadd.f32 %v2555_v30, %v3703_v24  ;;  %v1874_v16 = vpop.f32.mrb[59].mxu0 }
 0x2ff   :  { %v1875_v4 = vadd.f32 %v1874_v16, %v3703_v24 }
 0x300   :  { %1979 = vst.msk [vmem:[%s3952_s7 + $0x118] sm:$0xff] %vm1943_vm1, %v1880_v60 }
 0x301   :  { %1978 = vst.msk [vmem:[%s3952_s7 + $0x110] sm:$0xff] %vm1943_vm1, %v1875_v4  ;;  %v2558_v63 = vpop.f32.mrb[60].mxu0 }
 0x302   :  { %v1890_v50 = vadd.f32 %v2558_v63, %v3703_v24  ;;  %v1884_v18 = vpop.f32.mrb[61].mxu0 }
 0x303   :  { %v1885_v20 = vadd.f32 %v1884_v18, %v3703_v24 }
 0x304   :  { %1981 = vst.msk [vmem:[%s3952_s7 + $0x128] sm:$0xff] %vm1943_vm1, %v1890_v50 }
 0x305   :  { %1980 = vst.msk [vmem:[%s3952_s7 + $0x120] sm:$0xff] %vm1943_vm1, %v1885_v20  ;;  %v2561_v22 = vpop.f32.mrb[62].mxu0 }
 0x306   :  { %v1900_v15 = vadd.f32 %v2561_v22, %v3703_v24  ;;  %v1894_v26 = vpop.f32.mrb[63].mxu0 }
 0x307   :  { %v1895_v32 = vadd.f32 %v1894_v26, %v3703_v24 }
 0x308   :  { %1983 = vst.msk [vmem:[%s3952_s7 + $0x138] sm:$0xff] %vm1943_vm1, %v1900_v15 }
 0x309   :  { %1982 = vst.msk [vmem:[%s3952_s7 + $0x130] sm:$0xff] %vm1943_vm1, %v1895_v32  ;;  %v2564_v29 = vpop.f32.mrb[64].mxu0 }
 0x30a   :  { %v1910_v53 = vadd.f32 %v2564_v29, %v3703_v24  ;;  %v1904_v61 = vpop.f32.mrb[65].mxu0 }
 0x30b   :  { %v1905_v14 = vadd.f32 %v1904_v61, %v3703_v24 }
 0x30c   :  { %1985 = vst.msk [vmem:[%s3952_s7 + $0x148] sm:$0xff] %vm1943_vm1, %v1910_v53 }
 0x30d   :  { %1984 = vst.msk [vmem:[%s3952_s7 + $0x140] sm:$0xff] %vm1943_vm1, %v1905_v14  ;;  %v2567_v11 = vpop.f32.mrb[66].mxu0 }
 0x30e   :  { %v1920_v38 = vadd.f32 %v2567_v11, %v3703_v24  ;;  %v1914_v0 = vpop.f32.mrb[67].mxu0 }
 0x30f   :  { %v1915_v56 = vadd.f32 %v1914_v0, %v3703_v24 }
 0x310   :  { %1987 = vst.msk [vmem:[%s3952_s7 + $0x158] sm:$0xff] %vm1943_vm1, %v1920_v38 }
 0x311   :  { %1986 = vst.msk [vmem:[%s3952_s7 + $0x150] sm:$0xff] %vm1943_vm1, %v1915_v56  ;;  %v2570_v27 = vpop.f32.mrb[68].mxu0 }
 0x312   :  { %v1930_v51 = vadd.f32 %v2570_v27, %v3703_v24  ;;  %v1924_v41 = vpop.f32.mrb[69].mxu0 }
 0x313   :  { %v1925_v58 = vadd.f32 %v1924_v41, %v3703_v24 }
 0x314   :  { %1989 = vst.msk [vmem:[%s3952_s7 + $0x168] sm:$0xff] %vm1943_vm1, %v1930_v51 }
 0x315   :  { %1988 = vst.msk [vmem:[%s3952_s7 + $0x160] sm:$0xff] %vm1943_vm1, %v1925_v58  ;;  %v2573_v44 = vpop.f32.mrb[70].mxu0 }
 0x316   :  { %v1940_v7 = vadd.f32 %v2573_v44, %v3703_v24  ;;  %v1934_v48 = vpop.f32.mrb[71].mxu0 }
 0x317   :  { %v1935_v49 = vadd.f32 %v1934_v48, %v3703_v24 }
 0x318   :  { %1991 = vst.msk [vmem:[%s3952_s7 + $0x178] sm:$0xff] %vm1943_vm1, %v1940_v7 }
 0x319   :  { %1990 = vst.msk [vmem:[%s3952_s7 + $0x170] sm:$0xff] %vm1943_vm1, %v1935_v49 }

</bundles_post_ra>
